<compile_context>
chip_gen: v6e
topology: v6e:2x2x1
jax: 0.10.0
libtpu: 0.0.40
codegen_flags: <defaults>
</compile_context>

<pallas_src>
import functools
import math

import numpy as np
import jax
import jax.numpy as jnp
from jax.experimental import pallas as pl
from jax.experimental.pallas import tpu as pltpu

_NEG = -1e30  # finite "minus infinity" for masked softmax positions


def _round_up(x, m):
    return (x + m - 1) // m * m


# ----------------------------- LSTM kernel ----------------------------------
def _lstm_kernel(x_ref, lens_ref, w_ih_ref, w_hh_ref, b_ref,
                 out_ref, h_out_ref, h_scr, c_scr, xw_scr,
                 *, hidden_dim, padding_value):
    TB, T, E = x_ref.shape
    H = hidden_dim
    G = 4 * H

    # Hoisted input-to-hidden matmul: one (TB*T, E) x (E, 4H) MXU matmul
    # (bias folded here) instead of a tiny (TB, E) matmul per timestep.
    x_flat = x_ref[...].reshape(TB * T, E)
    xw_scr[...] = (jnp.dot(x_flat, w_ih_ref[...],
                           preferred_element_type=jnp.float32)
                   + b_ref[...]).reshape(TB, T, G)

    h_scr[...] = jnp.zeros_like(h_scr)
    c_scr[...] = jnp.zeros_like(c_scr)
    lens = lens_ref[...]                                       # (TB, 1) int32

    def step(t, carry):
        g_x = xw_scr[:, pl.ds(t, 1), :].reshape(TB, G)         # (TB, 4H)
        h = h_scr[...]
        c = c_scr[...]
        gates = g_x + jnp.dot(h, w_hh_ref[...],
                              preferred_element_type=jnp.float32)
        i_g = jax.nn.sigmoid(gates[:, 0:H])
        f_g = jax.nn.sigmoid(gates[:, H:2 * H])
        g_g = jnp.tanh(gates[:, 2 * H:3 * H])
        o_g = jax.nn.sigmoid(gates[:, 3 * H:4 * H])
        c_new = f_g * c + i_g * g_g
        h_new = o_g * jnp.tanh(c_new)
        valid = t < lens                                       # (TB, 1) bool
        # Packed-sequence semantics: freeze state past each sequence length,
        # write padding_value into padded positions of the unpacked output.
        h_scr[...] = jnp.where(valid, h_new, h)
        c_scr[...] = jnp.where(valid, c_new, c)
        masked = jnp.where(valid, h_new, jnp.full_like(h_new, padding_value))
        out_ref[:, pl.ds(t, 1), :] = masked[:, None, :]
        return carry

    jax.lax.fori_loop(0, T, step, 0)
    h_out_ref[...] = h_scr[...]


def lstm_layer(x, lens2d, w_ih_t, w_hh_t, bias2d, padding_value, tb):
    B, T, E = x.shape
    H = w_hh_t.shape[0]
    G = 4 * H
    kernel = functools.partial(_lstm_kernel, hidden_dim=H,
                               padding_value=float(padding_value))
    return pl.pallas_call(
        kernel,
        grid=(B // tb,),
        in_specs=[
            pl.BlockSpec((tb, T, E), lambda b: (b, 0, 0)),
            pl.BlockSpec((tb, 1), lambda b: (b, 0)),
            pl.BlockSpec((E, G), lambda b: (0, 0)),
            pl.BlockSpec((H, G), lambda b: (0, 0)),
            pl.BlockSpec((1, G), lambda b: (0, 0)),
        ],
        out_specs=(
            pl.BlockSpec((tb, T, H), lambda b: (b, 0, 0)),
            pl.BlockSpec((tb, H), lambda b: (b, 0)),
        ),
        out_shape=(jax.ShapeDtypeStruct((B, T, H), jnp.float32),
                   jax.ShapeDtypeStruct((B, H), jnp.float32)),
        scratch_shapes=[pltpu.VMEM((tb, H), jnp.float32),
                        pltpu.VMEM((tb, H), jnp.float32),
                        pltpu.VMEM((tb, T, G), jnp.float32)],
        compiler_params=pltpu.CompilerParams(
            dimension_semantics=("parallel",)),
    )(x, lens2d, w_ih_t, w_hh_t, bias2d)


# ------------------- Attention (+ fused output linear) -----------------------
def _attention_kernel(tvalid_ref, hidden_ref, enc_ref, w1_ref, w2_ref, b_ref,
                      v_ref, lin_w_ref, lin_b_ref, pred_ref,
                      hwb_scr, m_scr, l_scr, acc_scr):
    kt = pl.program_id(0)
    B, TT, H = enc_ref.shape

    @pl.when(kt == 0)
    def _():
        # Hoisted: hidden @ W1 with the attention bias folded in once.
        hwb_scr[...] = (jnp.dot(hidden_ref[...], w1_ref[...],
                                preferred_element_type=jnp.float32)
                        + b_ref[...])
        m_scr[...] = jnp.full_like(m_scr, _NEG)
        l_scr[...] = jnp.zeros_like(l_scr)
        acc_scr[...] = jnp.zeros_like(acc_scr)

    enc = enc_ref[...]                                           # (B, TT, H)
    eW = jnp.dot(enc.reshape(B * TT, H), w2_ref[...],
                 preferred_element_type=jnp.float32).reshape(B, TT, H)
    energy = jnp.tanh(hwb_scr[...][:, None, :] + eW)             # (B, TT, H)
    scores = jnp.sum(energy * v_ref[...][None, :, :], axis=2)    # (B, TT)

    # Mask positions >= T_max (pad_packed_sequence length) so the softmax runs
    # over exactly the same positions as the PyTorch reference.
    col = kt * TT + jax.lax.broadcasted_iota(jnp.int32, (B, TT), 1)
    scores = jnp.where(col < tvalid_ref[0], scores, _NEG)

    # Online (flash-style) softmax over the T tiles.
    m_new = jnp.maximum(m_scr[...], jnp.max(scores, axis=1, keepdims=True))
    a = jnp.exp(m_scr[...] - m_new)                              # (B, 1)
    p = jnp.exp(scores - m_new)                                  # (B, TT)
    l_scr[...] = a * l_scr[...] + jnp.sum(p, axis=1, keepdims=True)
    ctx_part = jnp.einsum("bqt,bth->bqh", p[:, None, :], enc,
                          preferred_element_type=jnp.float32)[:, 0, :]
    acc_scr[...] = a * acc_scr[...] + ctx_part
    m_scr[...] = m_new

    @pl.when(kt == pl.num_programs(0) - 1)
    def _():
        ctx = acc_scr[...] * pl.reciprocal(l_scr[...], approx=True)   # (B, H)
        # Fused output linear: pred_embed = ctx @ lin_w^T + lin_b
        pred_ref[...] = (jnp.dot(ctx, lin_w_ref[...],
                                 preferred_element_type=jnp.float32)
                         + lin_b_ref[...])


def attention_pred(t_valid, hidden, enc, w1, w2, b_row, v_row,
                   lin_w_t, lin_b_row, tt):
    B, T, H = enc.shape
    E = lin_w_t.shape[1]
    return pl.pallas_call(
        _attention_kernel,
        grid=(T // tt,),
        in_specs=[
            pl.BlockSpec(memory_space=pltpu.MemorySpace.SMEM),   # t_valid (1,)
            pl.BlockSpec((B, H), lambda k: (0, 0)),
            pl.BlockSpec((B, tt, H), lambda k: (0, k, 0)),
            pl.BlockSpec((H, H), lambda k: (0, 0)),
            pl.BlockSpec((H, H), lambda k: (0, 0)),
            pl.BlockSpec((1, H), lambda k: (0, 0)),
            pl.BlockSpec((1, H), lambda k: (0, 0)),
            pl.BlockSpec((H, E), lambda k: (0, 0)),
            pl.BlockSpec((1, E), lambda k: (0, 0)),
        ],
        out_specs=pl.BlockSpec((B, E), lambda k: (0, 0)),
        out_shape=jax.ShapeDtypeStruct((B, E), jnp.float32),
        scratch_shapes=[pltpu.VMEM((B, H), jnp.float32),   # hidden@W1 + b
                        pltpu.VMEM((B, 1), jnp.float32),   # running max
                        pltpu.VMEM((B, 1), jnp.float32),   # running sum
                        pltpu.VMEM((B, H), jnp.float32)],  # context accumulator
        compiler_params=pltpu.CompilerParams(
            dimension_semantics=("arbitrary",)),
    )(t_valid, hidden, enc, w1, w2, b_row, v_row, lin_w_t, lin_b_row)


# ------------------------ Vocab projection (V-tiled) --------------------------
def _projection_kernel(pred_ref, emb_ref, out_ref):
    # pred (B, E) x emb_tile (TV, E) contracted on E -> (B, TV); the embedding
    # is consumed in its natural (V, E) layout (no transpose in HBM).
    out_ref[...] = jax.lax.dot_general(
        pred_ref[...], emb_ref[...],
        dimension_numbers=(((1,), (1,)), ((), ())),
        preferred_element_type=jnp.float32)


def projection(pred, emb, tv):
    B, E = pred.shape
    V = emb.shape[0]
    return pl.pallas_call(
        _projection_kernel,
        grid=(V // tv,),
        in_specs=[pl.BlockSpec((B, E), lambda j: (0, 0)),
                  pl.BlockSpec((tv, E), lambda j: (j, 0))],
        out_specs=pl.BlockSpec((B, tv), lambda j: (0, j)),
        out_shape=jax.ShapeDtypeStruct((B, V), jnp.float32),
        compiler_params=pltpu.CompilerParams(
            dimension_semantics=("parallel",),       # v7x: 2 TCs split V
            vmem_limit_bytes=48 * 1024 * 1024),
    )(pred, emb)


# ------------------------------- Full forward --------------------------------
def forward(params, inputs, inputs_len, padding_idx, *, tb=8, tt=8, tv=128):
    inputs = jnp.asarray(inputs, jnp.int32)
    B, T = inputs.shape
    V, E = params["emb"].shape
    H = params["lstm"][0][1].shape[1]

    B_pad = _round_up(B, tb)
    T_pad = _round_up(T, tt)
    V_pad = _round_up(V, tv)

    # Pad batch (sublane alignment) and sequence (attention tile alignment).
    tok = jnp.full((B_pad, T_pad), padding_idx, jnp.int32).at[:B, :T].set(inputs)
    lens = jnp.zeros((B_pad,), jnp.int32).at[:B].set(
        jnp.asarray(inputs_len, jnp.int32))
    lens2d = lens.reshape(B_pad, 1)
    # pad_packed_sequence length as a device scalar -> no shape-dependent retrace.
    t_valid = jnp.max(jnp.asarray(inputs_len, jnp.int32)).reshape(1)

    x = params["emb"][tok]                        # (B_pad, T_pad, E), glue gather
    h_last = None
    for (w_ih, w_hh, b_ih, b_hh) in params["lstm"]:
        bias = (b_ih + b_hh).reshape(1, -1)
        # TODO(synk): weight transposes (small) could be pre-done at init time.
        x, h_last = lstm_layer(x, lens2d, w_ih.T, w_hh.T, bias, padding_idx, tb)

    attn_w = params["attn_w"]                     # (H, 2H)
    w1 = attn_w[:, :H].T
    w2 = attn_w[:, H:].T
    pred = attention_pred(t_valid, h_last, x, w1, w2,
                          params["attn_b"].reshape(1, H),
                          params["v"].reshape(1, H),
                          params["lin_w"].T, params["lin_b"].reshape(1, -1), tt)

    emb_p = params["emb"]
    if V_pad != V:
        emb_p = jnp.concatenate(
            [emb_p, jnp.zeros((V_pad - V, E), emb_p.dtype)], axis=0)
    proj = projection(pred, emb_p, tv)            # (B_pad, V_pad)
    return proj[:B, :V]


# ------------------------------- Pure-JAX ref ---------------------------------
def reference_forward(params, inputs, inputs_len, padding_idx):
    B, _ = inputs.shape
    H = params["lstm"][0][1].shape[1]
    T_max = int(np.max(inputs_len))
    lens = jnp.asarray(inputs_len, jnp.int32)
    x_seq = params["emb"][inputs][:, :T_max, :]
    h = None
    for (w_ih, w_hh, b_ih, b_hh) in params["lstm"]:
        h = jnp.zeros((B, H), jnp.float32)
        c = jnp.zeros((B, H), jnp.float32)
        outs = []
        for t in range(T_max):
            x_t = x_seq[:, t, :]
            gates = x_t @ w_ih.T + h @ w_hh.T + b_ih + b_hh
            i_g = jax.nn.sigmoid(gates[:, :H])
            f_g = jax.nn.sigmoid(gates[:, H:2 * H])
            g_g = jnp.tanh(gates[:, 2 * H:3 * H])
            o_g = jax.nn.sigmoid(gates[:, 3 * H:])
            c_new = f_g * c + i_g * g_g
            h_new = o_g * jnp.tanh(c_new)
            valid = (t < lens)[:, None]
            h = jnp.where(valid, h_new, h)
            c = jnp.where(valid, c_new, c)
            outs.append(jnp.where(valid, h_new, float(padding_idx)))
        x_seq = jnp.stack(outs, axis=1)
    enc = x_seq
    h_rep = jnp.broadcast_to(h[:, None, :], enc.shape)
    energy = jnp.tanh(jnp.concatenate([h_rep, enc], axis=2) @ params["attn_w"].T
                      + params["attn_b"])
    scores = energy @ params["v"]
    w = jax.nn.softmax(scores, axis=1)
    ctx = jnp.einsum("bt,bth->bh", w, enc)
    pred = ctx @ params["lin_w"].T + params["lin_b"]
    return pred @ params["emb"].T


# ------------------------------- Params init ----------------------------------
def init_params(key, vocab_size, embedding_dim, hidden_dim, num_layers, padding_idx):
    E, H, V = embedding_dim, hidden_dim, vocab_size
    ks = jax.random.split(key, 6 + 4 * num_layers)
    emb = 0.1 * jax.random.normal(ks[0], (V, E), jnp.float32)
    emb = emb.at[padding_idx].set(0.0)            # nn.Embedding padding_idx row
    lstm = []
    ki = 1
    in_dim = E
    for _ in range(num_layers):
        w_ih = 0.1 * jax.random.normal(ks[ki], (4 * H, in_dim), jnp.float32); ki += 1
        w_hh = 0.1 * jax.random.normal(ks[ki], (4 * H, H), jnp.float32); ki += 1
        b_ih = 0.1 * jax.random.normal(ks[ki], (4 * H,), jnp.float32); ki += 1
        b_hh = 0.1 * jax.random.normal(ks[ki], (4 * H,), jnp.float32); ki += 1
        lstm.append((w_ih, w_hh, b_ih, b_hh))
        in_dim = H
    attn_w = 0.1 * jax.random.normal(ks[ki], (H, 2 * H), jnp.float32)
    attn_b = 0.1 * jax.random.normal(ks[ki + 1], (H,), jnp.float32)
    v = (1.0 / math.sqrt(H)) * jax.random.normal(ks[ki + 2], (H,), jnp.float32)
    lin_w = 0.1 * jax.random.normal(ks[ki + 3], (E, H), jnp.float32)
    lin_b = 0.1 * jax.random.normal(ks[ki + 4], (E,), jnp.float32)
    return dict(emb=emb, lstm=lstm, attn_w=attn_w, attn_b=attn_b, v=v,
                lin_w=lin_w, lin_b=lin_b)


if __name__ == "__main__":
    B, T, E, H, V = 2, 12, 128, 128, 500
    padding_idx = 0
    num_layers = 1

    key = jax.random.PRNGKey(0)
    kp, kin = jax.random.split(key)
    params = init_params(kp, V, E, H, num_layers, padding_idx)

    inputs = jax.random.randint(kin, (B, T), 1, V, dtype=jnp.int32)
    inputs_len = np.array([12, 7], dtype=np.int32)   # packed-sequence lengths

    out = forward(params, inputs, inputs_len, padding_idx)
    out = jax.block_until_ready(out)

    ref = reference_forward(params, inputs, inputs_len, padding_idx)
    np.testing.assert_allclose(np.asarray(out), np.asarray(ref),
                               rtol=2e-3, atol=2e-3)

    print("KERNEL_OK")
</pallas_src>

<mosaic_0001>
module attributes {stable_mosaic.version = 11 : i64} {
  func.func @_lstm_kernel(%arg0: i32, %arg1: memref<8x16x128xf32, #tpu.memory_space<vmem>>, %arg2: memref<8x1xi32, #tpu.memory_space<vmem>>, %arg3: memref<128x512xf32, #tpu.memory_space<vmem>>, %arg4: memref<128x512xf32, #tpu.memory_space<vmem>>, %arg5: memref<1x512xf32, #tpu.memory_space<vmem>>, %arg6: memref<8x16x128xf32, #tpu.memory_space<vmem>>, %arg7: memref<8x128xf32, #tpu.memory_space<vmem>>, %arg8: memref<8x128xf32, #tpu.memory_space<vmem>>, %arg9: memref<8x128xf32, #tpu.memory_space<vmem>>, %arg10: memref<8x16x512xf32, #tpu.memory_space<vmem>>) attributes {dimension_semantics = [#tpu.dimension_semantics<parallel>], iteration_bounds = array<i64: 1>, scalar_prefetch = 0 : i64, scratch_operands = 3 : i64, tpu.core_type = #tpu.core_type<tc>, window_params = [{transform_indices = @transform_0, window_bounds = array<i64: 8, 16, 128>}, {transform_indices = @transform_1, window_bounds = array<i64: 8, 1>}, {pipeline_mode = #tpu.pipeline_mode<synchronous>, transform_indices = @transform_2, window_bounds = array<i64: 128, 512>}, {pipeline_mode = #tpu.pipeline_mode<synchronous>, transform_indices = @transform_3, window_bounds = array<i64: 128, 512>}, {pipeline_mode = #tpu.pipeline_mode<synchronous>, transform_indices = @transform_4, window_bounds = array<i64: 1, 512>}, {transform_indices = @transform_5, window_bounds = array<i64: 8, 16, 128>}, {transform_indices = @transform_6, window_bounds = array<i64: 8, 128>}]} {
    %c0 = arith.constant 0 : index
    %c0_0 = arith.constant 0 : index
    %c0_1 = arith.constant 0 : index
    %0 = vector.load %arg1[%c0, %c0_0, %c0_1] : memref<8x16x128xf32, #tpu.memory_space<vmem>>, vector<8x16x128xf32>
    %1 = vector.shape_cast %0 : vector<8x16x128xf32> to vector<128x128xf32>
    %c0_2 = arith.constant 0 : index
    %c0_3 = arith.constant 0 : index
    %2 = vector.load %arg3[%c0_2, %c0_3] : memref<128x512xf32, #tpu.memory_space<vmem>>, vector<128x512xf32>
    %cst = arith.constant dense<0.000000e+00> : vector<128x512xf32>
    %3 = tpu.matmul %1, %2, %cst {dimension_numbers = #tpu.dot_dimension_numbers<[1], [0], [0], [1], [0, 0, 1, 1], [], []>} : vector<128x128xf32>, vector<128x512xf32>, vector<128x512xf32> -> vector<128x512xf32>
    %c0_4 = arith.constant 0 : index
    %c0_5 = arith.constant 0 : index
    %4 = vector.load %arg5[%c0_4, %c0_5] : memref<1x512xf32, #tpu.memory_space<vmem>>, vector<1x512xf32>
    %5 = vector.broadcast %4 : vector<1x512xf32> to vector<128x512xf32>
    %6 = arith.addf %3, %5 : vector<128x512xf32>
    %7 = vector.shape_cast %6 : vector<128x512xf32> to vector<8x16x512xf32>
    %c0_6 = arith.constant 0 : index
    %c0_7 = arith.constant 0 : index
    %c0_8 = arith.constant 0 : index
    %8 = vector.load %arg10[%c0_6, %c0_7, %c0_8] : memref<8x16x512xf32, #tpu.memory_space<vmem>>, vector<8x16x512xf32>
    tpu.vector_store %arg10[%c0_6, %c0_7, %c0_8], %7 {strides = array<i32>} : memref<8x16x512xf32, #tpu.memory_space<vmem>>, vector<8x16x512xf32>,
    %cst_9 = arith.constant 0.000000e+00 : f32
    %9 = vector.broadcast %cst_9 : f32 to vector<8x128xf32>
    %c0_10 = arith.constant 0 : index
    %c0_11 = arith.constant 0 : index
    %10 = vector.load %arg8[%c0_10, %c0_11] : memref<8x128xf32, #tpu.memory_space<vmem>>, vector<8x128xf32>
    tpu.vector_store %arg8[%c0_10, %c0_11], %9 {strides = array<i32>} : memref<8x128xf32, #tpu.memory_space<vmem>>, vector<8x128xf32>,
    %cst_12 = arith.constant 0.000000e+00 : f32
    %11 = vector.broadcast %cst_12 : f32 to vector<8x128xf32>
    %c0_13 = arith.constant 0 : index
    %c0_14 = arith.constant 0 : index
    %12 = vector.load %arg9[%c0_13, %c0_14] : memref<8x128xf32, #tpu.memory_space<vmem>>, vector<8x128xf32>
    tpu.vector_store %arg9[%c0_13, %c0_14], %11 {strides = array<i32>} : memref<8x128xf32, #tpu.memory_space<vmem>>, vector<8x128xf32>,
    %c0_15 = arith.constant 0 : index
    %c0_16 = arith.constant 0 : index
    %13 = vector.load %arg2[%c0_15, %c0_16] : memref<8x1xi32, #tpu.memory_space<vmem>>, vector<8x1xi32>
    %c0_i32 = arith.constant 0 : i32
    %c16_i32 = arith.constant 16 : i32
    %14 = arith.addi %c0_i32, %c16_i32 : i32
    %c1_i32 = arith.constant 1 : i32
    scf.for %arg11 = %c0_i32 to %14 step %c1_i32  : i32 {
      %c0_22 = arith.constant 0 : index
      %17 = arith.index_cast %arg11 : i32 to index
      %c0_23 = arith.constant 0 : index
      %18 = vector.load %arg10[%c0_22, %17, %c0_23] : memref<8x16x512xf32, #tpu.memory_space<vmem>>, vector<8x1x512xf32>
      %19 = vector.shape_cast %18 : vector<8x1x512xf32> to vector<8x512xf32>
      %c0_24 = arith.constant 0 : index
      %c0_25 = arith.constant 0 : index
      %20 = vector.load %arg8[%c0_24, %c0_25] : memref<8x128xf32, #tpu.memory_space<vmem>>, vector<8x128xf32>
      %c0_26 = arith.constant 0 : index
      %c0_27 = arith.constant 0 : index
      %21 = vector.load %arg9[%c0_26, %c0_27] : memref<8x128xf32, #tpu.memory_space<vmem>>, vector<8x128xf32>
      %c0_28 = arith.constant 0 : index
      %c0_29 = arith.constant 0 : index
      %22 = vector.load %arg4[%c0_28, %c0_29] : memref<128x512xf32, #tpu.memory_space<vmem>>, vector<128x512xf32>
      %cst_30 = arith.constant dense<0.000000e+00> : vector<8x512xf32>
      %23 = tpu.matmul %20, %22, %cst_30 {dimension_numbers = #tpu.dot_dimension_numbers<[1], [0], [0], [1], [0, 0, 1, 1], [], []>} : vector<8x128xf32>, vector<128x512xf32>, vector<8x512xf32> -> vector<8x512xf32>
      %24 = arith.addf %19, %23 : vector<8x512xf32>
      %25 = vector.extract_strided_slice %24 {offsets = [0, 0], sizes = [8, 128], strides = [1, 1]} : vector<8x512xf32> to vector<8x128xf32>
      %26 = arith.negf %25 : vector<8x128xf32>
      %27 = math.exp %26 : vector<8x128xf32>
      %cst_31 = arith.constant 1.000000e+00 : f32
      %28 = vector.broadcast %cst_31 : f32 to vector<8x128xf32>
      %29 = arith.addf %28, %27 : vector<8x128xf32>
      %30 = arith.divf %28, %29 : vector<8x128xf32>
      %31 = vector.extract_strided_slice %24 {offsets = [0, 128], sizes = [8, 128], strides = [1, 1]} : vector<8x512xf32> to vector<8x128xf32>
      %32 = arith.negf %31 : vector<8x128xf32>
      %33 = math.exp %32 : vector<8x128xf32>
      %cst_32 = arith.constant 1.000000e+00 : f32
      %34 = vector.broadcast %cst_32 : f32 to vector<8x128xf32>
      %35 = arith.addf %34, %33 : vector<8x128xf32>
      %36 = arith.divf %34, %35 : vector<8x128xf32>
      %37 = vector.extract_strided_slice %24 {offsets = [0, 256], sizes = [8, 128], strides = [1, 1]} : vector<8x512xf32> to vector<8x128xf32>
      %38 = math.tanh %37 : vector<8x128xf32>
      %39 = vector.extract_strided_slice %24 {offsets = [0, 384], sizes = [8, 128], strides = [1, 1]} : vector<8x512xf32> to vector<8x128xf32>
      %40 = arith.negf %39 : vector<8x128xf32>
      %41 = math.exp %40 : vector<8x128xf32>
      %cst_33 = arith.constant 1.000000e+00 : f32
      %42 = vector.broadcast %cst_33 : f32 to vector<8x128xf32>
      %43 = arith.addf %42, %41 : vector<8x128xf32>
      %44 = arith.divf %42, %43 : vector<8x128xf32>
      %45 = arith.mulf %36, %21 : vector<8x128xf32>
      %46 = arith.mulf %30, %38 : vector<8x128xf32>
      %47 = arith.addf %45, %46 : vector<8x128xf32>
      %48 = math.tanh %47 : vector<8x128xf32>
      %49 = arith.mulf %44, %48 : vector<8x128xf32>
      %50 = vector.broadcast %arg11 : i32 to vector<8x1xi32>
      %51 = arith.cmpi slt, %50, %13 : vector<8x1xi32>
      %52 = vector.shape_cast %51 : vector<8x1xi1> to vector<8x1xi1>
      %53 = vector.broadcast %52 : vector<8x1xi1> to vector<8x128xi1>
      %54 = arith.select %53, %49, %20 : vector<8x128xi1>, vector<8x128xf32>
      %c0_34 = arith.constant 0 : index
      %c0_35 = arith.constant 0 : index
      %55 = vector.load %arg8[%c0_34, %c0_35] : memref<8x128xf32, #tpu.memory_space<vmem>>, vector<8x128xf32>
      tpu.vector_store %arg8[%c0_34, %c0_35], %54 {strides = array<i32>} : memref<8x128xf32, #tpu.memory_space<vmem>>, vector<8x128xf32>,
      %56 = vector.shape_cast %51 : vector<8x1xi1> to vector<8x1xi1>
      %57 = vector.broadcast %56 : vector<8x1xi1> to vector<8x128xi1>
      %58 = arith.select %57, %47, %21 : vector<8x128xi1>, vector<8x128xf32>
      %c0_36 = arith.constant 0 : index
      %c0_37 = arith.constant 0 : index
      %59 = vector.load %arg9[%c0_36, %c0_37] : memref<8x128xf32, #tpu.memory_space<vmem>>, vector<8x128xf32>
      tpu.vector_store %arg9[%c0_36, %c0_37], %58 {strides = array<i32>} : memref<8x128xf32, #tpu.memory_space<vmem>>, vector<8x128xf32>,
      %cst_38 = arith.constant 0.000000e+00 : f32
      %60 = vector.broadcast %cst_38 : f32 to vector<8x128xf32>
      %61 = vector.shape_cast %51 : vector<8x1xi1> to vector<8x1xi1>
      %62 = vector.broadcast %61 : vector<8x1xi1> to vector<8x128xi1>
      %63 = arith.select %62, %49, %60 : vector<8x128xi1>, vector<8x128xf32>
      %64 = vector.shape_cast %63 : vector<8x128xf32> to vector<8x1x128xf32>
      %c0_39 = arith.constant 0 : index
      %65 = arith.index_cast %arg11 : i32 to index
      %c0_40 = arith.constant 0 : index
      %66 = vector.load %arg6[%c0_39, %65, %c0_40] : memref<8x16x128xf32, #tpu.memory_space<vmem>>, vector<8x1x128xf32>
      tpu.vector_store %arg6[%c0_39, %65, %c0_40], %64 {strides = array<i32>} : memref<8x16x128xf32, #tpu.memory_space<vmem>>, vector<8x1x128xf32>,
    }
    %c16_i32_17 = arith.constant 16 : i32
    %c0_18 = arith.constant 0 : index
    %c0_19 = arith.constant 0 : index
    %15 = vector.load %arg8[%c0_18, %c0_19] : memref<8x128xf32, #tpu.memory_space<vmem>>, vector<8x128xf32>
    %c0_20 = arith.constant 0 : index
    %c0_21 = arith.constant 0 : index
    %16 = vector.load %arg7[%c0_20, %c0_21] : memref<8x128xf32, #tpu.memory_space<vmem>>, vector<8x128xf32>
    tpu.vector_store %arg7[%c0_20, %c0_21], %15 {strides = array<i32>} : memref<8x128xf32, #tpu.memory_space<vmem>>, vector<8x128xf32>,
    return
  }
  func.func @transform_0(%arg0: i32) -> (i32, i32, i32) {
    %c0_i32 = arith.constant 0 : i32
    %c0_i32_0 = arith.constant 0 : i32
    %c0_i32_1 = arith.constant 0 : i32
    return %arg0, %c0_i32, %c0_i32_0 : i32, i32, i32
  }
  func.func @transform_1(%arg0: i32) -> (i32, i32) {
    %c0_i32 = arith.constant 0 : i32
    %c0_i32_0 = arith.constant 0 : i32
    return %arg0, %c0_i32 : i32, i32
  }
  func.func @transform_2(%arg0: i32) -> (i32, i32) {
    %c0_i32 = arith.constant 0 : i32
    %c0_i32_0 = arith.constant 0 : i32
    %c0_i32_1 = arith.constant 0 : i32
    return %c0_i32, %c0_i32_0 : i32, i32
  }
  func.func @transform_3(%arg0: i32) -> (i32, i32) {
    %c0_i32 = arith.constant 0 : i32
    %c0_i32_0 = arith.constant 0 : i32
    %c0_i32_1 = arith.constant 0 : i32
    return %c0_i32, %c0_i32_0 : i32, i32
  }
  func.func @transform_4(%arg0: i32) -> (i32, i32) {
    %c0_i32 = arith.constant 0 : i32
    %c0_i32_0 = arith.constant 0 : i32
    %c0_i32_1 = arith.constant 0 : i32
    return %c0_i32, %c0_i32_0 : i32, i32
  }
  func.func @transform_5(%arg0: i32) -> (i32, i32, i32) {
    %c0_i32 = arith.constant 0 : i32
    %c0_i32_0 = arith.constant 0 : i32
    %c0_i32_1 = arith.constant 0 : i32
    return %arg0, %c0_i32, %c0_i32_0 : i32, i32, i32
  }
  func.func @transform_6(%arg0: i32) -> (i32, i32) {
    %c0_i32 = arith.constant 0 : i32
    %c0_i32_0 = arith.constant 0 : i32
    return %arg0, %c0_i32 : i32, i32
  }
}

</mosaic_0001>

<bundles_post_ra>
// kernel: tpu_custom_call.1
= control target key start
LH: loop header
LB: loop body
LE: loop exit
PB: predicated region body
PF: predicated region fallthrough
CT: control target
= control target key end

     0   :  { %12 = vsyncpa [#allocation6], 0  ;;  %s2095_s0 = inlined_call_operand.hbm [shape: f32[8,16,128], index: 0, kind: input, shape index: {}]   ;;  %s2096_s1 = inlined_call_operand.vmem [shape: s32[8,1], index: 1, kind: input, shape index: {}]   ;;  %s2097_s2 = inlined_call_operand.hbm [shape: f32[128,512], index: 2, kind: input, shape index: {}]   ;;  %s2098_s3 = inlined_call_operand.hbm [shape: f32[128,512], index: 3, kind: input, shape index: {}]   ;;  %s2099_s4 = inlined_call_operand.vmem [shape: f32[1,512], index: 4, kind: input, shape index: {}]   ;;  %s2100_s5 = inlined_call_operand.hbm [shape: f32[8,16,128], index: 5, kind: output, shape index: {0}]   ;;  %s2101_s6 = inlined_call_operand.hbm [shape: f32[8,128], index: 6, kind: output, shape index: {1}]  }
   0x1   :  { %13 = vsyncpa [#allocation9], 0 }
   0x2   :  { %14 = vsyncpa [#allocation7], 0 }
   0x3   :  { %15 = vsyncpa [#allocation13], 0  ;;  %s1772_s21 = smov [#allocation8]  }
   0x4   :  { %s35_s22 = sshll.u32 %s1772_s21, 4  ;;  %s36_s22 = int_to_ptr.vmem [resolvable:$true] %s35_s22 }
   0x5   :  { %s1664_s23 = scalar_lea.vmem %s36_s22, 8192  ;;  %p1669_p1 = scmp.lt.s32.totalorder %s36_s22, %s36_s22 }
   0x6   :  { %p1665_p0 = scmp.ne.s32.totalorder %s36_s22, %s1664_s23  ;;  %p1670_p2 = scmp.lt.s32.totalorder %s1664_s23, %s1664_s23 }
   0x8   :  { %p1671_p3 = por %p1670_p2, %p1669_p1 }
   0xa   :  { %p1672_p4 = pnand %p1671_p3, %p1665_p0 }
   0xc   :  { %1675 = shalt.err (!%p1672_p4)
}
   0xd   :  { %s1773_s24 = smov 512   ;;  %s1774_s25 = smov 32  }
   0xe   :  { %41 = dma.hbm_to_vmem [thread:$0]  %s2097_s2, 8192, %s36_s22, [#allocation9], %s1773_s24, %s1773_s24, %s1774_s25  }
   0xf   :  { %s1775_s28 = smov [#allocation5]  }
  0x10   :  { %s21_s29 = sshll.u32 %s1775_s28, 4  ;;  %s22_s29 = int_to_ptr.vmem [resolvable:$true] %s21_s29 }
  0x11   :  { %s1684_s30 = scalar_lea.vmem %s22_s29, 2048  ;;  %p1689_p6 = scmp.lt.s32.totalorder %s22_s29, %s22_s29 }
  0x12   :  { %p1685_p5 = scmp.ne.s32.totalorder %s22_s29, %s1684_s30  ;;  %p1690_p7 = scmp.lt.s32.totalorder %s1684_s30, %s1684_s30 }
  0x14   :  { %p1691_p8 = por %p1690_p7, %p1689_p6 }
  0x16   :  { %p1692_p9 = pnand %p1691_p8, %p1685_p5 }
  0x18   :  { %1695 = shalt.err (!%p1692_p9)
}
  0x19   :  { %s1776_s7 = smov 128   ;;  %s1777_s8 = smov 8  }
  0x1a   :  { %27 = dma.hbm_to_vmem [thread:$0]  %s2095_s0, 2048, %s22_s29, [#allocation6], %s1776_s7, %s1776_s7, %s1777_s8  }
  0x1b   :  { %s1778_s2 = smov [#allocation10]  }
  0x1c   :  { %s47_s11 = sshll.u32 %s1778_s2, 4  ;;  %s48_s11 = int_to_ptr.vmem [resolvable:$true] %s47_s11 }
  0x1d   :  { %s1704_s12 = scalar_lea.vmem %s48_s11, 8192  ;;  %p1709_p11 = scmp.lt.s32.totalorder %s48_s11, %s48_s11 }
  0x1e   :  { %p1705_p10 = scmp.ne.s32.totalorder %s48_s11, %s1704_s12  ;;  %p1710_p12 = scmp.lt.s32.totalorder %s1704_s12, %s1704_s12 }
  0x20   :  { %p1711_p13 = por %p1710_p12, %p1709_p11 }
  0x22   :  { %p1712_p0 = pnand %p1711_p13, %p1705_p10 }
  0x24   :  { %1715 = shalt.err (!%p1712_p0)
}
  0x25   :  { %53 = dma.hbm_to_vmem [thread:$0]  %s2098_s3, 8192, %s48_s11, [#allocation9], %s1773_s24, %s1773_s24, %s1774_s25  }
  0x26   :  { %1760 = dma.done.wait [#allocation6], 2048  }
  0x27   :  { %1761 = vsyncadd [#allocation6], 4294965248 }
  0x28   :  { %1762 = dma.done.wait [#allocation9], 16384  }
  0x29   :  { %1763 = vsyncadd [#allocation9], 4294950912  ;;  %v1779_v0 = vmov 0.0   ;;  %v1839_v1 = vld [vmem:[%s2096_s1] sm:$0xff]  ;;  %v142_v2 = vld [vmem:[#allocation8 + $0x1e8] sm:$0xff] }
  0x2a   :  { %553 = vst [vmem:[#allocation2] sm:$0xff] %v1779_v0  ;;  %554 = vst [vmem:[#allocation3] sm:$0xff] %v1779_v0  ;;  %231 = vmatprep.mubr.f32.mxu0 %v1779_v0  ;;  %392 = vmatprep.mubr.f32.mxu1 %v1779_v0  ;;  %v144_v3 = vld [vmem:[#allocation8 + $0x1f8] sm:$0xff]  ;;  %v141_v4 = vld [vmem:[#allocation8 + $0x1e0] sm:$0xff] }
  0x2b   :  { %167 = vmatprep.subr.mxu0 %v142_v2  ;;  %328 = vmatprep.subr.mxu1 %v144_v3  ;;  %v143_v5 = vld [vmem:[#allocation8 + $0x1f0] sm:$0xff]  ;;  %v138_v6 = vld [vmem:[#allocation8 + $0x1c8] sm:$0xff]  ;;  %v140_v7 = vld [vmem:[#allocation8 + $0x1d8] sm:$0xff] }
  0x2c   :  { %168 = vmatpush1.msra.mxu0 %v141_v4  ;;  %329 = vmatpush1.msra.mxu1 %v143_v5  ;;  %v137_v8 = vld [vmem:[#allocation8 + $0x1c0] sm:$0xff]  ;;  %v139_v9 = vld [vmem:[#allocation8 + $0x1d0] sm:$0xff]  ;;  %v134_v10 = vld [vmem:[#allocation8 + $0x1a8] sm:$0xff] }
  0x2d   :  { %169 = vmatprep.subr.mxu0 %v138_v6  ;;  %330 = vmatprep.subr.mxu1 %v140_v7  ;;  %v136_v11 = vld [vmem:[#allocation8 + $0x1b8] sm:$0xff]  ;;  %v133_v12 = vld [vmem:[#allocation8 + $0x1a0] sm:$0xff]  ;;  %v135_v13 = vld [vmem:[#allocation8 + $0x1b0] sm:$0xff] }
  0x2e   :  { %170 = vmatpush1.msra.mxu0 %v137_v8  ;;  %331 = vmatpush1.msra.mxu1 %v139_v9  ;;  %v130_v14 = vld [vmem:[#allocation8 + $0x188] sm:$0xff]  ;;  %v132_v15 = vld [vmem:[#allocation8 + $0x198] sm:$0xff]  ;;  %v129_v16 = vld [vmem:[#allocation8 + $0x180] sm:$0xff] }
  0x2f   :  { %171 = vmatprep.subr.mxu0 %v134_v10  ;;  %332 = vmatprep.subr.mxu1 %v136_v11  ;;  %v131_v17 = vld [vmem:[#allocation8 + $0x190] sm:$0xff]  ;;  %v126_v18 = vld [vmem:[#allocation8 + $0x168] sm:$0xff]  ;;  %v128_v19 = vld [vmem:[#allocation8 + $0x178] sm:$0xff] }
  0x30   :  { %172 = vmatpush1.msra.mxu0 %v133_v12  ;;  %333 = vmatpush1.msra.mxu1 %v135_v13  ;;  %v125_v20 = vld [vmem:[#allocation8 + $0x160] sm:$0xff]  ;;  %v127_v21 = vld [vmem:[#allocation8 + $0x170] sm:$0xff]  ;;  %v122_v22 = vld [vmem:[#allocation8 + $0x148] sm:$0xff] }
  0x31   :  { %173 = vmatprep.subr.mxu0 %v130_v14  ;;  %334 = vmatprep.subr.mxu1 %v132_v15  ;;  %v124_v23 = vld [vmem:[#allocation8 + $0x158] sm:$0xff]  ;;  %v121_v24 = vld [vmem:[#allocation8 + $0x140] sm:$0xff]  ;;  %v123_v25 = vld [vmem:[#allocation8 + $0x150] sm:$0xff] }
  0x32   :  { %174 = vmatpush1.msra.mxu0 %v129_v16  ;;  %335 = vmatpush1.msra.mxu1 %v131_v17  ;;  %v118_v26 = vld [vmem:[#allocation8 + $0x128] sm:$0xff]  ;;  %v120_v27 = vld [vmem:[#allocation8 + $0x138] sm:$0xff]  ;;  %v117_v28 = vld [vmem:[#allocation8 + $0x120] sm:$0xff] }
  0x33   :  { %175 = vmatprep.subr.mxu0 %v126_v18  ;;  %336 = vmatprep.subr.mxu1 %v128_v19  ;;  %v119_v29 = vld [vmem:[#allocation8 + $0x130] sm:$0xff]  ;;  %v114_v30 = vld [vmem:[#allocation8 + $0x108] sm:$0xff]  ;;  %v116_v31 = vld [vmem:[#allocation8 + $0x118] sm:$0xff] }
  0x34   :  { %176 = vmatpush1.msra.mxu0 %v125_v20  ;;  %337 = vmatpush1.msra.mxu1 %v127_v21  ;;  %v113_v32 = vld [vmem:[#allocation8 + $0x100] sm:$0xff]  ;;  %v115_v33 = vld [vmem:[#allocation8 + $0x110] sm:$0xff]  ;;  %v110_v34 = vld [vmem:[#allocation8 + $0xe8] sm:$0xff]  ;;  %v147_v20 = vlaneseq }
  0x35   :  { %177 = vmatprep.subr.mxu0 %v122_v22  ;;  %338 = vmatprep.subr.mxu1 %v124_v23  ;;  %v112_v35 = vld [vmem:[#allocation8 + $0xf8] sm:$0xff]  ;;  %v109_v36 = vld [vmem:[#allocation8 + $0xe0] sm:$0xff]  ;;  %v111_v37 = vld [vmem:[#allocation8 + $0xf0] sm:$0xff] }
  0x36   :  { %178 = vmatpush1.msra.mxu0 %v121_v24  ;;  %339 = vmatpush1.msra.mxu1 %v123_v25  ;;  %v106_v38 = vld [vmem:[#allocation8 + $0xc8] sm:$0xff]  ;;  %v108_v39 = vld [vmem:[#allocation8 + $0xd8] sm:$0xff]  ;;  %v105_v40 = vld [vmem:[#allocation8 + $0xc0] sm:$0xff]  ;;  %v1871_v21 = vshrl.u32 %v147_v20, 7 }
  0x37   :  { %179 = vmatprep.subr.mxu0 %v118_v26  ;;  %340 = vmatprep.subr.mxu1 %v120_v27  ;;  %v107_v41 = vld [vmem:[#allocation8 + $0xd0] sm:$0xff]  ;;  %v102_v42 = vld [vmem:[#allocation8 + $0xa8] sm:$0xff]  ;;  %v104_v43 = vld [vmem:[#allocation8 + $0xb8] sm:$0xff] }
  0x38   :  { %180 = vmatpush1.msra.mxu0 %v117_v28  ;;  %341 = vmatpush1.msra.mxu1 %v119_v29  ;;  %v101_v44 = vld [vmem:[#allocation8 + $0xa0] sm:$0xff]  ;;  %v103_v45 = vld [vmem:[#allocation8 + $0xb0] sm:$0xff]  ;;  %v98_v46 = vld [vmem:[#allocation8 + $0x88] sm:$0xff]  ;;  %v149_v22 = vsub.s32 0, %v1871_v21  ;;  %v157_v23 = vsub.s32 2, %v1871_v21  ;;  %v153_v25 = vsub.s32 1, %v1871_v21 }
  0x39   :  { %181 = vmatprep.subr.mxu0 %v114_v30  ;;  %342 = vmatprep.subr.mxu1 %v116_v31  ;;  %v100_v47 = vld [vmem:[#allocation8 + $0x98] sm:$0xff]  ;;  %v97_v48 = vld [vmem:[#allocation8 + $0x80] sm:$0xff]  ;;  %v99_v49 = vld [vmem:[#allocation8 + $0x90] sm:$0xff]  ;;  %v161_v26 = vsub.s32 3, %v1871_v21 }
  0x3a   :  { %182 = vmatpush1.msra.mxu0 %v113_v32  ;;  %343 = vmatpush1.msra.mxu1 %v115_v33  ;;  %v94_v50 = vld [vmem:[#allocation8 + $0x68] sm:$0xff]  ;;  %v96_v51 = vld [vmem:[#allocation8 + $0x78] sm:$0xff]  ;;  %v93_v52 = vld [vmem:[#allocation8 + $0x60] sm:$0xff] }
  0x3b   :  { %183 = vmatprep.subr.mxu0 %v110_v34  ;;  %344 = vmatprep.subr.mxu1 %v112_v35  ;;  %v95_v53 = vld [vmem:[#allocation8 + $0x70] sm:$0xff]  ;;  %v90_v54 = vld [vmem:[#allocation8 + $0x48] sm:$0xff]  ;;  %v92_v55 = vld [vmem:[#allocation8 + $0x58] sm:$0xff] }
  0x3c   :  { %184 = vmatpush1.msra.mxu0 %v109_v36  ;;  %345 = vmatpush1.msra.mxu1 %v111_v37  ;;  %v89_v56 = vld [vmem:[#allocation8 + $0x40] sm:$0xff]  ;;  %v91_v57 = vld [vmem:[#allocation8 + $0x50] sm:$0xff]  ;;  %v86_v58 = vld [vmem:[#allocation8 + $0x28] sm:$0xff] }
  0x3d   :  { %185 = vmatprep.subr.mxu0 %v106_v38  ;;  %346 = vmatprep.subr.mxu1 %v108_v39  ;;  %v88_v59 = vld [vmem:[#allocation8 + $0x38] sm:$0xff]  ;;  %v85_v60 = vld [vmem:[#allocation8 + $0x20] sm:$0xff]  ;;  %v87_v61 = vld [vmem:[#allocation8 + $0x30] sm:$0xff] }
  0x3e   :  { %186 = vmatpush1.msra.mxu0 %v105_v40  ;;  %347 = vmatpush1.msra.mxu1 %v107_v41  ;;  %v82_v62 = vld [vmem:[#allocation8 + $0x8] sm:$0xff]  ;;  %v84_v63 = vld [vmem:[#allocation8 + $0x18] sm:$0xff]  ;;  %v81_v2 = vld [vmem:[#allocation8] sm:$0xff] }
  0x3f   :  { %187 = vmatprep.subr.mxu0 %v102_v42  ;;  %348 = vmatprep.subr.mxu1 %v104_v43  ;;  %v83_v3 = vld [vmem:[#allocation8 + $0x10] sm:$0xff]  ;;  %v65_v4 = vld [vmem:[#allocation5] sm:$0xff]  ;;  %v66_v5 = vld [vmem:[#allocation5 + $0x8] sm:$0xff] }
  0x40   :  { %188 = vmatpush1.msra.mxu0 %v101_v44  ;;  %349 = vmatpush1.msra.mxu1 %v103_v45  ;;  %v67_v6 = vld [vmem:[#allocation5 + $0x10] sm:$0xff]  ;;  %v68_v7 = vld [vmem:[#allocation5 + $0x18] sm:$0xff]  ;;  %v69_v8 = vld [vmem:[#allocation5 + $0x20] sm:$0xff] }
  0x41   :  { %189 = vmatprep.subr.mxu0 %v98_v46  ;;  %350 = vmatprep.subr.mxu1 %v100_v47  ;;  %v70_v9 = vld [vmem:[#allocation5 + $0x28] sm:$0xff]  ;;  %v71_v10 = vld [vmem:[#allocation5 + $0x30] sm:$0xff]  ;;  %v72_v11 = vld [vmem:[#allocation5 + $0x38] sm:$0xff] }
  0x42   :  { %190 = vmatpush1.msra.mxu0 %v97_v48  ;;  %351 = vmatpush1.msra.mxu1 %v99_v49  ;;  %v73_v12 = vld [vmem:[#allocation5 + $0x40] sm:$0xff]  ;;  %v74_v13 = vld [vmem:[#allocation5 + $0x48] sm:$0xff]  ;;  %v75_v14 = vld [vmem:[#allocation5 + $0x50] sm:$0xff] }
  0x43   :  { %191 = vmatprep.subr.mxu0 %v94_v50  ;;  %352 = vmatprep.subr.mxu1 %v96_v51  ;;  %v76_v15 = vld [vmem:[#allocation5 + $0x58] sm:$0xff]  ;;  %v77_v16 = vld [vmem:[#allocation5 + $0x60] sm:$0xff]  ;;  %v78_v17 = vld [vmem:[#allocation5 + $0x68] sm:$0xff] }
  0x44   :  { %192 = vmatpush1.msra.mxu0 %v93_v52  ;;  %353 = vmatpush1.msra.mxu1 %v95_v53  ;;  %v79_v18 = vld [vmem:[#allocation5 + $0x70] sm:$0xff]  ;;  %v80_v19 = vld [vmem:[#allocation5 + $0x78] sm:$0xff] }
  0x45   :  { %193 = vmatprep.subr.mxu0 %v90_v54  ;;  %354 = vmatprep.subr.mxu1 %v92_v55  ;;  %v145_v24 = vld [vmem:[%s2099_s4] sm:$0xf]  ;;  %s1952_s4 = smov 0  }
  0x46   :  { %194 = vmatpush1.msra.mxu0 %v89_v56  ;;  %355 = vmatpush1.msra.mxu1 %v91_v57  ;;  %v1880_v27 = vrot.slane %v145_v24, %v149_v22  ;;  %v1884_v28 = vrot.slane %v145_v24, %v153_v25  ;;  %v1886_v29 = vrot.slane %v145_v24, %v161_v26 }
  0x47   :  { %195 = vmatprep.subr.mxu0 %v86_v58  ;;  %356 = vmatprep.subr.mxu1 %v88_v59 }
  0x48   :  { %196 = vmatpush1.msra.mxu0 %v85_v60  ;;  %357 = vmatpush1.msra.mxu1 %v87_v61 }
  0x49   :  { %197 = vmatprep.subr.mxu0 %v82_v62  ;;  %358 = vmatprep.subr.mxu1 %v84_v63 }
  0x4a   :  { %198 = vmatpush1.msra.mxu0 %v81_v2  ;;  %359 = vmatpush1.msra.mxu1 %v83_v3 }
  0x4b   :  { %232 = vmatmul.mubr.f32.vlgmr.msra.gmra.mxu0 %v65_v4  ;;  %393 = vmatmul.mubr.f32.vlgmr.msra.gmra.mxu1 %v65_v4 }
  0x4c   :  { %237 = vmatprep.mubr.f32.mxu0 %v1779_v0  ;;  %398 = vmatprep.mubr.f32.mxu1 %v1779_v0 }
  0x4f   :  { %238 = vmatmul.mubr.f32.gmra.mxu0 %v66_v5  ;;  %399 = vmatmul.mubr.f32.gmra.mxu1 %v66_v5 }
  0x50   :  { %243 = vmatprep.mubr.f32.mxu0 %v1779_v0  ;;  %404 = vmatprep.mubr.f32.mxu1 %v1779_v0 }
  0x53   :  { %244 = vmatmul.mubr.f32.gmra.mxu0 %v67_v6  ;;  %405 = vmatmul.mubr.f32.gmra.mxu1 %v67_v6 }
  0x54   :  { %249 = vmatprep.mubr.f32.mxu0 %v1779_v0  ;;  %410 = vmatprep.mubr.f32.mxu1 %v1779_v0 }
  0x57   :  { %250 = vmatmul.mubr.f32.gmra.mxu0 %v68_v7  ;;  %411 = vmatmul.mubr.f32.gmra.mxu1 %v68_v7 }
  0x58   :  { %255 = vmatprep.mubr.f32.mxu0 %v1779_v0  ;;  %416 = vmatprep.mubr.f32.mxu1 %v1779_v0 }
  0x5b   :  { %256 = vmatmul.mubr.f32.gmra.mxu0 %v69_v8  ;;  %417 = vmatmul.mubr.f32.gmra.mxu1 %v69_v8 }
  0x5c   :  { %261 = vmatprep.mubr.f32.mxu0 %v1779_v0  ;;  %422 = vmatprep.mubr.f32.mxu1 %v1779_v0 }
  0x5f   :  { %262 = vmatmul.mubr.f32.gmra.mxu0 %v70_v9  ;;  %423 = vmatmul.mubr.f32.gmra.mxu1 %v70_v9 }
  0x60   :  { %267 = vmatprep.mubr.f32.mxu0 %v1779_v0  ;;  %428 = vmatprep.mubr.f32.mxu1 %v1779_v0 }
  0x63   :  { %268 = vmatmul.mubr.f32.gmra.mxu0 %v71_v10  ;;  %429 = vmatmul.mubr.f32.gmra.mxu1 %v71_v10 }
  0x64   :  { %273 = vmatprep.mubr.f32.mxu0 %v1779_v0  ;;  %434 = vmatprep.mubr.f32.mxu1 %v1779_v0 }
  0x67   :  { %274 = vmatmul.mubr.f32.gmra.mxu0 %v72_v11  ;;  %435 = vmatmul.mubr.f32.gmra.mxu1 %v72_v11 }
  0x68   :  { %279 = vmatprep.mubr.f32.mxu0 %v1779_v0  ;;  %440 = vmatprep.mubr.f32.mxu1 %v1779_v0 }
  0x6b   :  { %280 = vmatmul.mubr.f32.gmra.mxu0 %v73_v12  ;;  %441 = vmatmul.mubr.f32.gmra.mxu1 %v73_v12 }
  0x6c   :  { %285 = vmatprep.mubr.f32.mxu0 %v1779_v0  ;;  %446 = vmatprep.mubr.f32.mxu1 %v1779_v0 }
  0x6f   :  { %286 = vmatmul.mubr.f32.gmra.mxu0 %v74_v13  ;;  %447 = vmatmul.mubr.f32.gmra.mxu1 %v74_v13 }
  0x70   :  { %291 = vmatprep.mubr.f32.mxu0 %v1779_v0  ;;  %452 = vmatprep.mubr.f32.mxu1 %v1779_v0 }
  0x73   :  { %292 = vmatmul.mubr.f32.gmra.mxu0 %v75_v14  ;;  %453 = vmatmul.mubr.f32.gmra.mxu1 %v75_v14 }
  0x74   :  { %297 = vmatprep.mubr.f32.mxu0 %v1779_v0  ;;  %458 = vmatprep.mubr.f32.mxu1 %v1779_v0 }
  0x77   :  { %298 = vmatmul.mubr.f32.gmra.mxu0 %v76_v15  ;;  %459 = vmatmul.mubr.f32.gmra.mxu1 %v76_v15 }
  0x78   :  { %303 = vmatprep.mubr.f32.mxu0 %v1779_v0  ;;  %464 = vmatprep.mubr.f32.mxu1 %v1779_v0 }
  0x7b   :  { %304 = vmatmul.mubr.f32.gmra.mxu0 %v77_v16  ;;  %465 = vmatmul.mubr.f32.gmra.mxu1 %v77_v16 }
  0x7c   :  { %309 = vmatprep.mubr.f32.mxu0 %v1779_v0  ;;  %470 = vmatprep.mubr.f32.mxu1 %v1779_v0 }
  0x7f   :  { %310 = vmatmul.mubr.f32.gmra.mxu0 %v78_v17  ;;  %471 = vmatmul.mubr.f32.gmra.mxu1 %v78_v17 }
  0x80   :  { %315 = vmatprep.mubr.f32.mxu0 %v1779_v0  ;;  %476 = vmatprep.mubr.f32.mxu1 %v1779_v0 }
  0x83   :  { %316 = vmatmul.mubr.f32.gmra.mxu0 %v79_v18  ;;  %477 = vmatmul.mubr.f32.gmra.mxu1 %v79_v18 }
  0x84   :  { %321 = vmatprep.mubr.f32.mxu0 %v1779_v0  ;;  %482 = vmatprep.mubr.f32.mxu1 %v1779_v0  ;;  %v1882_v0 = vrot.slane %v145_v24, %v157_v23 }
  0x87   :  { %322 = vmatmul.mubr.f32.gmra.mxu0 %v80_v19  ;;  %483 = vmatmul.mubr.f32.gmra.mxu1 %v80_v19 }
 0x10b   :  { %v233_v30 = vpop.f32.mrf.mxu0  ;;  %v394_v31 = vpop.f32.mrf.mxu1 }
 0x10c   :  { %v234_v32 = vadd.f32 %v233_v30, %v1880_v27  ;;  %v395_v33 = vadd.f32 %v394_v31, %v1882_v0 }
 0x10d   :  { %v235_v34 = vpop.f32.mrf.mxu0  ;;  %v396_v35 = vpop.f32.mrf.mxu1 }
 0x10e   :  { %489 = vst [vmem:[#allocation4] sm:$0xff] %v234_v32  ;;  %491 = vst [vmem:[#allocation4 + $0x10] sm:$0xff] %v395_v33  ;;  %v236_v36 = vadd.f32 %v235_v34, %v1884_v28  ;;  %v397_v37 = vadd.f32 %v396_v35, %v1886_v29 }
 0x10f   :  { %v239_v38 = vpop.f32.mrf.mxu0  ;;  %v400_v39 = vpop.f32.mrf.mxu1 }
 0x110   :  { %490 = vst [vmem:[#allocation4 + $0x8] sm:$0xff] %v236_v36  ;;  %492 = vst [vmem:[#allocation4 + $0x18] sm:$0xff] %v397_v37  ;;  %v240_v40 = vadd.f32 %v239_v38, %v1880_v27  ;;  %v401_v41 = vadd.f32 %v400_v39, %v1882_v0 }
 0x111   :  { %v241_v42 = vpop.f32.mrf.mxu0  ;;  %v402_v43 = vpop.f32.mrf.mxu1 }
 0x112   :  { %493 = vst [vmem:[#allocation4 + $0x20] sm:$0xff] %v240_v40  ;;  %495 = vst [vmem:[#allocation4 + $0x30] sm:$0xff] %v401_v41  ;;  %v242_v44 = vadd.f32 %v241_v42, %v1884_v28  ;;  %v403_v45 = vadd.f32 %v402_v43, %v1886_v29 }
 0x113   :  { %v245_v46 = vpop.f32.mrf.mxu0  ;;  %v406_v47 = vpop.f32.mrf.mxu1 }
 0x114   :  { %494 = vst [vmem:[#allocation4 + $0x28] sm:$0xff] %v242_v44  ;;  %496 = vst [vmem:[#allocation4 + $0x38] sm:$0xff] %v403_v45  ;;  %v246_v48 = vadd.f32 %v245_v46, %v1880_v27  ;;  %v407_v49 = vadd.f32 %v406_v47, %v1882_v0 }
 0x115   :  { %v247_v50 = vpop.f32.mrf.mxu0  ;;  %v408_v51 = vpop.f32.mrf.mxu1 }
 0x116   :  { %497 = vst [vmem:[#allocation4 + $0x40] sm:$0xff] %v246_v48  ;;  %499 = vst [vmem:[#allocation4 + $0x50] sm:$0xff] %v407_v49  ;;  %v248_v52 = vadd.f32 %v247_v50, %v1884_v28  ;;  %v409_v53 = vadd.f32 %v408_v51, %v1886_v29 }
 0x117   :  { %v251_v54 = vpop.f32.mrf.mxu0  ;;  %v412_v55 = vpop.f32.mrf.mxu1 }
 0x118   :  { %498 = vst [vmem:[#allocation4 + $0x48] sm:$0xff] %v248_v52  ;;  %500 = vst [vmem:[#allocation4 + $0x58] sm:$0xff] %v409_v53  ;;  %v252_v56 = vadd.f32 %v251_v54, %v1880_v27  ;;  %v413_v57 = vadd.f32 %v412_v55, %v1882_v0 }
 0x119   :  { %v253_v58 = vpop.f32.mrf.mxu0  ;;  %v414_v59 = vpop.f32.mrf.mxu1 }
 0x11a   :  { %501 = vst [vmem:[#allocation4 + $0x60] sm:$0xff] %v252_v56  ;;  %503 = vst [vmem:[#allocation4 + $0x70] sm:$0xff] %v413_v57  ;;  %v254_v60 = vadd.f32 %v253_v58, %v1884_v28  ;;  %v415_v61 = vadd.f32 %v414_v59, %v1886_v29 }
 0x11b   :  { %v257_v62 = vpop.f32.mrf.mxu0  ;;  %v418_v63 = vpop.f32.mrf.mxu1 }
 0x11c   :  { %502 = vst [vmem:[#allocation4 + $0x68] sm:$0xff] %v254_v60  ;;  %504 = vst [vmem:[#allocation4 + $0x78] sm:$0xff] %v415_v61  ;;  %v258_v2 = vadd.f32 %v257_v62, %v1880_v27  ;;  %v419_v3 = vadd.f32 %v418_v63, %v1882_v0 }
 0x11d   :  { %v259_v4 = vpop.f32.mrf.mxu0  ;;  %v420_v5 = vpop.f32.mrf.mxu1 }
 0x11e   :  { %505 = vst [vmem:[#allocation4 + $0x80] sm:$0xff] %v258_v2  ;;  %507 = vst [vmem:[#allocation4 + $0x90] sm:$0xff] %v419_v3  ;;  %v260_v6 = vadd.f32 %v259_v4, %v1884_v28  ;;  %v421_v7 = vadd.f32 %v420_v5, %v1886_v29 }
 0x11f   :  { %v263_v8 = vpop.f32.mrf.mxu0  ;;  %v424_v9 = vpop.f32.mrf.mxu1 }
 0x120   :  { %506 = vst [vmem:[#allocation4 + $0x88] sm:$0xff] %v260_v6  ;;  %508 = vst [vmem:[#allocation4 + $0x98] sm:$0xff] %v421_v7  ;;  %v264_v10 = vadd.f32 %v263_v8, %v1880_v27  ;;  %v425_v11 = vadd.f32 %v424_v9, %v1882_v0 }
 0x121   :  { %v265_v12 = vpop.f32.mrf.mxu0  ;;  %v426_v13 = vpop.f32.mrf.mxu1 }
 0x122   :  { %509 = vst [vmem:[#allocation4 + $0xa0] sm:$0xff] %v264_v10  ;;  %511 = vst [vmem:[#allocation4 + $0xb0] sm:$0xff] %v425_v11  ;;  %v266_v14 = vadd.f32 %v265_v12, %v1884_v28  ;;  %v427_v15 = vadd.f32 %v426_v13, %v1886_v29 }
 0x123   :  { %v269_v16 = vpop.f32.mrf.mxu0  ;;  %v430_v17 = vpop.f32.mrf.mxu1 }
 0x124   :  { %510 = vst [vmem:[#allocation4 + $0xa8] sm:$0xff] %v266_v14  ;;  %512 = vst [vmem:[#allocation4 + $0xb8] sm:$0xff] %v427_v15  ;;  %v270_v18 = vadd.f32 %v269_v16, %v1880_v27  ;;  %v431_v19 = vadd.f32 %v430_v17, %v1882_v0 }
 0x125   :  { %v271_v20 = vpop.f32.mrf.mxu0  ;;  %v432_v22 = vpop.f32.mrf.mxu1 }
 0x126   :  { %513 = vst [vmem:[#allocation4 + $0xc0] sm:$0xff] %v270_v18  ;;  %515 = vst [vmem:[#allocation4 + $0xd0] sm:$0xff] %v431_v19  ;;  %v272_v23 = vadd.f32 %v271_v20, %v1884_v28  ;;  %v433_v24 = vadd.f32 %v432_v22, %v1886_v29 }
 0x127   :  { %v275_v25 = vpop.f32.mrf.mxu0  ;;  %v436_v26 = vpop.f32.mrf.mxu1 }
 0x128   :  { %514 = vst [vmem:[#allocation4 + $0xc8] sm:$0xff] %v272_v23  ;;  %516 = vst [vmem:[#allocation4 + $0xd8] sm:$0xff] %v433_v24  ;;  %v276_v30 = vadd.f32 %v275_v25, %v1880_v27  ;;  %v437_v31 = vadd.f32 %v436_v26, %v1882_v0 }
 0x129   :  { %v277_v32 = vpop.f32.mrf.mxu0  ;;  %v438_v33 = vpop.f32.mrf.mxu1 }
 0x12a   :  { %517 = vst [vmem:[#allocation4 + $0xe0] sm:$0xff] %v276_v30  ;;  %519 = vst [vmem:[#allocation4 + $0xf0] sm:$0xff] %v437_v31  ;;  %v278_v34 = vadd.f32 %v277_v32, %v1884_v28  ;;  %v439_v35 = vadd.f32 %v438_v33, %v1886_v29 }
 0x12b   :  { %v281_v36 = vpop.f32.mrf.mxu0  ;;  %v442_v37 = vpop.f32.mrf.mxu1 }
 0x12c   :  { %518 = vst [vmem:[#allocation4 + $0xe8] sm:$0xff] %v278_v34  ;;  %520 = vst [vmem:[#allocation4 + $0xf8] sm:$0xff] %v439_v35  ;;  %v282_v38 = vadd.f32 %v281_v36, %v1880_v27  ;;  %v443_v39 = vadd.f32 %v442_v37, %v1882_v0 }
 0x12d   :  { %v283_v40 = vpop.f32.mrf.mxu0  ;;  %v444_v41 = vpop.f32.mrf.mxu1 }
 0x12e   :  { %521 = vst [vmem:[#allocation4 + $0x100] sm:$0xff] %v282_v38  ;;  %523 = vst [vmem:[#allocation4 + $0x110] sm:$0xff] %v443_v39  ;;  %v284_v42 = vadd.f32 %v283_v40, %v1884_v28  ;;  %v445_v43 = vadd.f32 %v444_v41, %v1886_v29 }
 0x12f   :  { %v287_v44 = vpop.f32.mrf.mxu0  ;;  %v448_v45 = vpop.f32.mrf.mxu1 }
 0x130   :  { %522 = vst [vmem:[#allocation4 + $0x108] sm:$0xff] %v284_v42  ;;  %524 = vst [vmem:[#allocation4 + $0x118] sm:$0xff] %v445_v43  ;;  %v288_v46 = vadd.f32 %v287_v44, %v1880_v27  ;;  %v449_v47 = vadd.f32 %v448_v45, %v1882_v0 }
 0x131   :  { %v289_v48 = vpop.f32.mrf.mxu0  ;;  %v450_v49 = vpop.f32.mrf.mxu1 }
 0x132   :  { %525 = vst [vmem:[#allocation4 + $0x120] sm:$0xff] %v288_v46  ;;  %527 = vst [vmem:[#allocation4 + $0x130] sm:$0xff] %v449_v47  ;;  %v290_v50 = vadd.f32 %v289_v48, %v1884_v28  ;;  %v451_v51 = vadd.f32 %v450_v49, %v1886_v29 }
 0x133   :  { %v293_v52 = vpop.f32.mrf.mxu0  ;;  %v454_v53 = vpop.f32.mrf.mxu1 }
 0x134   :  { %526 = vst [vmem:[#allocation4 + $0x128] sm:$0xff] %v290_v50  ;;  %528 = vst [vmem:[#allocation4 + $0x138] sm:$0xff] %v451_v51  ;;  %v294_v54 = vadd.f32 %v293_v52, %v1880_v27  ;;  %v455_v55 = vadd.f32 %v454_v53, %v1882_v0 }
 0x135   :  { %v295_v56 = vpop.f32.mrf.mxu0  ;;  %v456_v57 = vpop.f32.mrf.mxu1 }
 0x136   :  { %529 = vst [vmem:[#allocation4 + $0x140] sm:$0xff] %v294_v54  ;;  %531 = vst [vmem:[#allocation4 + $0x150] sm:$0xff] %v455_v55  ;;  %v296_v58 = vadd.f32 %v295_v56, %v1884_v28  ;;  %v457_v59 = vadd.f32 %v456_v57, %v1886_v29 }
 0x137   :  { %v299_v60 = vpop.f32.mrf.mxu0  ;;  %v460_v61 = vpop.f32.mrf.mxu1 }
 0x138   :  { %530 = vst [vmem:[#allocation4 + $0x148] sm:$0xff] %v296_v58  ;;  %532 = vst [vmem:[#allocation4 + $0x158] sm:$0xff] %v457_v59  ;;  %v300_v62 = vadd.f32 %v299_v60, %v1880_v27  ;;  %v461_v63 = vadd.f32 %v460_v61, %v1882_v0 }
 0x139   :  { %v301_v2 = vpop.f32.mrf.mxu0  ;;  %v462_v3 = vpop.f32.mrf.mxu1 }
 0x13a   :  { %533 = vst [vmem:[#allocation4 + $0x160] sm:$0xff] %v300_v62  ;;  %535 = vst [vmem:[#allocation4 + $0x170] sm:$0xff] %v461_v63  ;;  %v302_v4 = vadd.f32 %v301_v2, %v1884_v28  ;;  %v463_v5 = vadd.f32 %v462_v3, %v1886_v29 }
 0x13b   :  { %v305_v6 = vpop.f32.mrf.mxu0  ;;  %v466_v7 = vpop.f32.mrf.mxu1 }
 0x13c   :  { %534 = vst [vmem:[#allocation4 + $0x168] sm:$0xff] %v302_v4  ;;  %536 = vst [vmem:[#allocation4 + $0x178] sm:$0xff] %v463_v5  ;;  %v306_v8 = vadd.f32 %v305_v6, %v1880_v27  ;;  %v467_v9 = vadd.f32 %v466_v7, %v1882_v0 }
 0x13d   :  { %v307_v10 = vpop.f32.mrf.mxu0  ;;  %v468_v11 = vpop.f32.mrf.mxu1 }
 0x13e   :  { %537 = vst [vmem:[#allocation4 + $0x180] sm:$0xff] %v306_v8  ;;  %539 = vst [vmem:[#allocation4 + $0x190] sm:$0xff] %v467_v9  ;;  %v308_v12 = vadd.f32 %v307_v10, %v1884_v28  ;;  %v469_v13 = vadd.f32 %v468_v11, %v1886_v29 }
 0x13f   :  { %v311_v14 = vpop.f32.mrf.mxu0  ;;  %v472_v15 = vpop.f32.mrf.mxu1 }
 0x140   :  { %538 = vst [vmem:[#allocation4 + $0x188] sm:$0xff] %v308_v12  ;;  %540 = vst [vmem:[#allocation4 + $0x198] sm:$0xff] %v469_v13  ;;  %v312_v16 = vadd.f32 %v311_v14, %v1880_v27  ;;  %v473_v17 = vadd.f32 %v472_v15, %v1882_v0 }
 0x141   :  { %v313_v18 = vpop.f32.mrf.mxu0  ;;  %v474_v19 = vpop.f32.mrf.mxu1 }
 0x142   :  { %541 = vst [vmem:[#allocation4 + $0x1a0] sm:$0xff] %v312_v16  ;;  %543 = vst [vmem:[#allocation4 + $0x1b0] sm:$0xff] %v473_v17  ;;  %v314_v20 = vadd.f32 %v313_v18, %v1884_v28  ;;  %v475_v22 = vadd.f32 %v474_v19, %v1886_v29 }
 0x143   :  { %v317_v23 = vpop.f32.mrf.mxu0  ;;  %v478_v24 = vpop.f32.mrf.mxu1 }
 0x144   :  { %542 = vst [vmem:[#allocation4 + $0x1a8] sm:$0xff] %v314_v20  ;;  %544 = vst [vmem:[#allocation4 + $0x1b8] sm:$0xff] %v475_v22  ;;  %v318_v25 = vadd.f32 %v317_v23, %v1880_v27  ;;  %v479_v26 = vadd.f32 %v478_v24, %v1882_v0 }
 0x145   :  { %v319_v30 = vpop.f32.mrf.mxu0  ;;  %v480_v31 = vpop.f32.mrf.mxu1 }
 0x146   :  { %545 = vst [vmem:[#allocation4 + $0x1c0] sm:$0xff] %v318_v25  ;;  %547 = vst [vmem:[#allocation4 + $0x1d0] sm:$0xff] %v479_v26  ;;  %v320_v32 = vadd.f32 %v319_v30, %v1884_v28  ;;  %v481_v33 = vadd.f32 %v480_v31, %v1886_v29 }
 0x147   :  { %v323_v34 = vpop.f32.mrf.mxu0  ;;  %v484_v35 = vpop.f32.mrf.mxu1 }
 0x148   :  { %546 = vst [vmem:[#allocation4 + $0x1c8] sm:$0xff] %v320_v32  ;;  %548 = vst [vmem:[#allocation4 + $0x1d8] sm:$0xff] %v481_v33  ;;  %v324_v36 = vadd.f32 %v323_v34, %v1880_v27  ;;  %v485_v37 = vadd.f32 %v484_v35, %v1882_v0 }
 0x149   :  { %v325_v38 = vpop.f32.mrf.mxu0  ;;  %v486_v39 = vpop.f32.mrf.mxu1 }
 0x14a   :  { %549 = vst [vmem:[#allocation4 + $0x1e0] sm:$0xff] %v324_v36  ;;  %551 = vst [vmem:[#allocation4 + $0x1f0] sm:$0xff] %v485_v37  ;;  %v326_v40 = vadd.f32 %v325_v38, %v1884_v28  ;;  %v487_v41 = vadd.f32 %v486_v39, %v1886_v29 }
 0x14c   :  { %550 = vst [vmem:[#allocation4 + $0x1e8] sm:$0xff] %v326_v40  ;;  %552 = vst [vmem:[#allocation4 + $0x1f8] sm:$0xff] %v487_v41 }
 0x14d LB: > { %v655_v27 = vld [vmem:[#allocation10 + $0x1e8] sm:$0xff]  ;;  %v657_v42 = vld [vmem:[#allocation10 + $0x1f8] sm:$0xff]  ;;  %v654_v0 = vld [vmem:[#allocation10 + $0x1e0] sm:$0xff]  ;;  %v1194_v40 = vstv %s1770_s4  ;;  %s562_s16 = sshra.s32 %s1770_s4, 3  ;;  %s565_s17 = sand.u32 7, %s1770_s4  ;;  %s1770_s4 = sphi %s1952_s4, %s561_s4  }
 0x14e   : > { %658 = vmatprep.subr.mxu0 %v655_v27  ;;  %729 = vmatprep.subr.mxu1 %v657_v42  ;;  %v656_v43 = vld [vmem:[#allocation10 + $0x1f0] sm:$0xff]  ;;  %v651_v44 = vld [vmem:[#allocation10 + $0x1c8] sm:$0xff]  ;;  %v653_v45 = vld [vmem:[#allocation10 + $0x1d8] sm:$0xff]  ;;  %vm1195_vm0 = vcmp.lt.s32.totalorder %v1194_v40, %v1839_v1  ;;  %s1504_s18 = sshll.u32 %s562_s16, 5  ;;  %s1380_s21 = scalar_lea.vmem [#allocation11], %s1770_s4 }
 0x14f   : > { %659 = vmatpush1.msra.mxu0 %v654_v0  ;;  %730 = vmatpush1.msra.mxu1 %v656_v43  ;;  %v650_v28 = vld [vmem:[#allocation10 + $0x1c0] sm:$0xff]  ;;  %v652_v29 = vld [vmem:[#allocation10 + $0x1d0] sm:$0xff]  ;;  %v647_v46 = vld [vmem:[#allocation10 + $0x1a8] sm:$0xff]  ;;  %s568_s19 = sadd.s32 %s1504_s18, %s565_s17  ;;  %s561_s4 = sadd.s32 1, %s1770_s4  }
 0x150   : > { %660 = vmatprep.subr.mxu0 %v651_v44  ;;  %731 = vmatprep.subr.mxu1 %v653_v45  ;;  %v649_v47 = vld [vmem:[#allocation10 + $0x1b8] sm:$0xff]  ;;  %v646_v48 = vld [vmem:[#allocation10 + $0x1a0] sm:$0xff]  ;;  %v648_v49 = vld [vmem:[#allocation10 + $0x1b0] sm:$0xff]  ;;  %v1780_v44 = vmov 0.0   ;;  %v1781_v45 = vmov 0   ;;  %s569_s20 = scalar_lea.vmem [#allocation4], %s568_s19 }
 0x151   : > { %661 = vmatpush1.msra.mxu0 %v650_v28  ;;  %732 = vmatpush1.msra.mxu1 %v652_v29  ;;  %v643_v50 = vld [vmem:[#allocation10 + $0x188] sm:$0xff]  ;;  %v645_v51 = vld [vmem:[#allocation10 + $0x198] sm:$0xff]  ;;  %v642_v52 = vld [vmem:[#allocation10 + $0x180] sm:$0xff]  ;;  %v1196_v28 = vsel %vm1195_vm0, 1, %v1781_v45  ;;  %v1782_v29 = vmov 1966171168  }
 0x152   : > { %662 = vmatprep.subr.mxu0 %v647_v46  ;;  %733 = vmatprep.subr.mxu1 %v649_v47  ;;  %v644_v53 = vld [vmem:[#allocation10 + $0x190] sm:$0xff]  ;;  %v639_v54 = vld [vmem:[#allocation10 + $0x168] sm:$0xff]  ;;  %v641_v55 = vld [vmem:[#allocation10 + $0x178] sm:$0xff]  ;;  %v809_v46 = vunpack.c.l.s4 %v1782_v29  ;;  %p558_p1 = scmp.ge.s32.totalorder %s561_s4, 16  }
 0x153   : > { %663 = vmatpush1.msra.mxu0 %v646_v48  ;;  %734 = vmatpush1.msra.mxu1 %v648_v49  ;;  %v638_v56 = vld [vmem:[#allocation10 + $0x160] sm:$0xff]  ;;  %v640_v57 = vld [vmem:[#allocation10 + $0x170] sm:$0xff]  ;;  %v635_v58 = vld [vmem:[#allocation10 + $0x148] sm:$0xff]  ;;  %s1783_s22 = smov (%p558_p1), [#allocation11]   ;;  %s1784_s24 = smov (%p558_p1), [#allocation12]  }
 0x154   : > { %664 = vmatprep.subr.mxu0 %v643_v50  ;;  %735 = vmatprep.subr.mxu1 %v645_v51  ;;  %v637_v59 = vld [vmem:[#allocation10 + $0x158] sm:$0xff]  ;;  %v634_v60 = vld [vmem:[#allocation10 + $0x140] sm:$0xff]  ;;  %v636_v61 = vld [vmem:[#allocation10 + $0x150] sm:$0xff]  ;;  %v810_v47 = vunpack.c.0.s8 %v809_v46  ;;  %s1396_s23 = sshll.u32 (%p558_p1), %s1783_s22, 4  ;;  %s1409_s25 = sshll.u32 (%p558_p1), %s1784_s24, 4  ;;  %s1397_s23 = int_to_ptr.vmem [resolvable:$true] %s1396_s23  ;;  %s1410_s25 = int_to_ptr.vmem [resolvable:$true] %s1409_s25 }
 0x155   : > { %665 = vmatpush1.msra.mxu0 %v642_v52  ;;  %736 = vmatpush1.msra.mxu1 %v644_v53  ;;  %v631_v62 = vld [vmem:[#allocation10 + $0x128] sm:$0xff]  ;;  %v633_v63 = vld [vmem:[#allocation10 + $0x138] sm:$0xff]  ;;  %v630_v2 = vld [vmem:[#allocation10 + $0x120] sm:$0xff]  ;;  %s1716_s26 = scalar_lea.vmem (%p558_p1), %s1397_s23, 2048  ;;  %p1721_p3 = scmp.lt.s32.totalorder (%p558_p1), %s1397_s23, %s1397_s23 }
 0x156   : > { %666 = vmatprep.subr.mxu0 %v639_v54  ;;  %737 = vmatprep.subr.mxu1 %v641_v55  ;;  %v632_v3 = vld [vmem:[#allocation10 + $0x130] sm:$0xff]  ;;  %v627_v4 = vld [vmem:[#allocation10 + $0x108] sm:$0xff]  ;;  %v629_v5 = vld [vmem:[#allocation10 + $0x118] sm:$0xff]  ;;  %v1966_v50 = vsub.s32 %v810_v47, %v1871_v21  ;;  %p1717_p2 = scmp.ne.s32.totalorder (%p558_p1), %s1397_s23, %s1716_s26  ;;  %p1722_p4 = scmp.lt.s32.totalorder (%p558_p1), %s1716_s26, %s1716_s26 }
 0x157   : > { %667 = vmatpush1.msra.mxu0 %v638_v56  ;;  %738 = vmatpush1.msra.mxu1 %v640_v57  ;;  %v626_v6 = vld [vmem:[#allocation10 + $0x100] sm:$0xff]  ;;  %v628_v7 = vld [vmem:[#allocation10 + $0x110] sm:$0xff]  ;;  %v623_v8 = vld [vmem:[#allocation10 + $0xe8] sm:$0xff] }
 0x158   : > { %668 = vmatprep.subr.mxu0 %v635_v58  ;;  %739 = vmatprep.subr.mxu1 %v637_v59  ;;  %v625_v9 = vld [vmem:[#allocation10 + $0xf8] sm:$0xff]  ;;  %v622_v10 = vld [vmem:[#allocation10 + $0xe0] sm:$0xff]  ;;  %v624_v11 = vld [vmem:[#allocation10 + $0xf0] sm:$0xff]  ;;  %p1723_p5 = por (%p558_p1), %p1722_p4, %p1721_p3 }
 0x159   : > { %669 = vmatpush1.msra.mxu0 %v634_v60  ;;  %740 = vmatpush1.msra.mxu1 %v636_v61  ;;  %v619_v12 = vld [vmem:[#allocation10 + $0xc8] sm:$0xff]  ;;  %v621_v13 = vld [vmem:[#allocation10 + $0xd8] sm:$0xff]  ;;  %v618_v14 = vld [vmem:[#allocation10 + $0xc0] sm:$0xff] }
 0x15a   : > { %670 = vmatprep.subr.mxu0 %v631_v62  ;;  %741 = vmatprep.subr.mxu1 %v633_v63  ;;  %v620_v15 = vld [vmem:[#allocation10 + $0xd0] sm:$0xff]  ;;  %v615_v16 = vld [vmem:[#allocation10 + $0xa8] sm:$0xff]  ;;  %v617_v17 = vld [vmem:[#allocation10 + $0xb8] sm:$0xff]  ;;  %p1724_p6 = pnand (%p558_p1), %p1723_p5, %p1717_p2 }
 0x15b   : > { %671 = vmatpush1.msra.mxu0 %v630_v2  ;;  %742 = vmatpush1.msra.mxu1 %v632_v3  ;;  %v614_v18 = vld [vmem:[#allocation10 + $0xa0] sm:$0xff]  ;;  %v616_v19 = vld [vmem:[#allocation10 + $0xb0] sm:$0xff]  ;;  %v611_v20 = vld [vmem:[#allocation10 + $0x88] sm:$0xff] }
 0x15c   : > { %672 = vmatprep.subr.mxu0 %v627_v4  ;;  %743 = vmatprep.subr.mxu1 %v629_v5  ;;  %v613_v22 = vld [vmem:[#allocation10 + $0x98] sm:$0xff]  ;;  %v610_v23 = vld [vmem:[#allocation10 + $0x80] sm:$0xff]  ;;  %v612_v24 = vld [vmem:[#allocation10 + $0x90] sm:$0xff] }
 0x15d   : > { %673 = vmatpush1.msra.mxu0 %v626_v6  ;;  %744 = vmatpush1.msra.mxu1 %v628_v7  ;;  %v607_v25 = vld [vmem:[#allocation10 + $0x68] sm:$0xff]  ;;  %v609_v26 = vld [vmem:[#allocation10 + $0x78] sm:$0xff]  ;;  %v606_v30 = vld [vmem:[#allocation10 + $0x60] sm:$0xff] }
 0x15e   : > { %674 = vmatprep.subr.mxu0 %v623_v8  ;;  %745 = vmatprep.subr.mxu1 %v625_v9  ;;  %v608_v31 = vld [vmem:[#allocation10 + $0x70] sm:$0xff]  ;;  %v603_v32 = vld [vmem:[#allocation10 + $0x48] sm:$0xff]  ;;  %v605_v33 = vld [vmem:[#allocation10 + $0x58] sm:$0xff] }
 0x15f   : > { %675 = vmatpush1.msra.mxu0 %v622_v10  ;;  %746 = vmatpush1.msra.mxu1 %v624_v11  ;;  %v602_v34 = vld [vmem:[#allocation10 + $0x40] sm:$0xff]  ;;  %v604_v35 = vld [vmem:[#allocation10 + $0x50] sm:$0xff]  ;;  %v599_v36 = vld [vmem:[#allocation10 + $0x28] sm:$0xff] }
 0x160   : > { %676 = vmatprep.subr.mxu0 %v619_v12  ;;  %747 = vmatprep.subr.mxu1 %v621_v13  ;;  %v601_v37 = vld [vmem:[#allocation10 + $0x38] sm:$0xff]  ;;  %v598_v38 = vld [vmem:[#allocation10 + $0x20] sm:$0xff]  ;;  %v600_v39 = vld [vmem:[#allocation10 + $0x30] sm:$0xff] }
 0x161   : > { %677 = vmatpush1.msra.mxu0 %v618_v14  ;;  %748 = vmatpush1.msra.mxu1 %v620_v15  ;;  %v595_v41 = vld [vmem:[#allocation10 + $0x8] sm:$0xff]  ;;  %v597_v27 = vld [vmem:[#allocation10 + $0x18] sm:$0xff]  ;;  %v594_v42 = vld [vmem:[#allocation10] sm:$0xff] }
 0x162   : > { %678 = vmatprep.subr.mxu0 %v615_v16  ;;  %749 = vmatprep.subr.mxu1 %v617_v17  ;;  %v596_v0 = vld [vmem:[#allocation10 + $0x10] sm:$0xff] }
 0x163   : > { %679 = vmatpush1.msra.mxu0 %v614_v18  ;;  %750 = vmatpush1.msra.mxu1 %v616_v19  ;;  %v1959_v43 = vld [vmem:[#allocation2] sm:$0xff] }
 0x164   : > { %680 = vmatprep.subr.mxu0 %v611_v20  ;;  %751 = vmatprep.subr.mxu1 %v613_v22  ;;  %v570_v3 = vld [vmem:[%s569_s20] ss:$8 sm:$0xf] }
 0x165   : > { %681 = vmatpush1.msra.mxu0 %v610_v23  ;;  %752 = vmatpush1.msra.mxu1 %v612_v24  ;;  %v1463_v4 = vld [vmem:[%s569_s20 + $0x40] ss:$8 sm:$0xf] }
 0x166   : > { %682 = vmatprep.subr.mxu0 %v607_v25  ;;  %753 = vmatprep.subr.mxu1 %v609_v26  ;;  %v1465_v5 = vld [vmem:[%s569_s20 + $0x80] ss:$8 sm:$0xf] }
 0x167   : > { %683 = vmatpush1.msra.mxu0 %v606_v30  ;;  %754 = vmatpush1.msra.mxu1 %v608_v31  ;;  %v1469_v6 = vld [vmem:[%s569_s20 + $0x100] ss:$8 sm:$0xf] }
 0x168   : > { %684 = vmatprep.subr.mxu0 %v603_v32  ;;  %755 = vmatprep.subr.mxu1 %v605_v33  ;;  %v1467_v11 = vld [vmem:[%s569_s20 + $0xc0] ss:$8 sm:$0xf] }
 0x169   : > { %685 = vmatpush1.msra.mxu0 %v602_v34  ;;  %756 = vmatpush1.msra.mxu1 %v604_v35  ;;  %v1471_v12 = vld [vmem:[%s569_s20 + $0x140] ss:$8 sm:$0xf] }
 0x16a   : > { %686 = vmatprep.subr.mxu0 %v599_v36  ;;  %757 = vmatprep.subr.mxu1 %v601_v37  ;;  %v1473_v13 = vld [vmem:[%s569_s20 + $0x180] ss:$8 sm:$0xf] }
 0x16b   : > { %687 = vmatpush1.msra.mxu0 %v598_v38  ;;  %758 = vmatpush1.msra.mxu1 %v600_v39  ;;  %v1475_v18 = vld [vmem:[%s569_s20 + $0x1c0] ss:$8 sm:$0xf] }
 0x16c   : > { %688 = vmatprep.subr.mxu0 %v595_v41  ;;  %759 = vmatprep.subr.mxu1 %v597_v27 }
 0x16d   : > { %689 = vmatpush1.msra.mxu0 %v594_v42  ;;  %722 = vmatprep.mubr.f32.mxu0 %v1780_v44 }
 0x16e   : > { %760 = vmatpush1.msra.mxu1 %v596_v0  ;;  %793 = vmatprep.mubr.f32.mxu1 %v1780_v44 }
 0x16f   : > { %723 = vmatmul.mubr.f32.vlgmr.msra.gmra.mxu0 %v1959_v43  ;;  %794 = vmatmul.mubr.f32.vlgmr.msra.gmra.mxu1 %v1959_v43 }
 0x170   : > { %1526 = vset.pattern.permute.xlu0 %v1781_v45 }
 0x171   : > { %1198 = vperm.xlu0 %1526, %v1196_v28  }
 0x22f   : > { %v724_v48 = vpop.f32.mrf.mxu0  ;;  %v795_v49 = vpop.f32.mrf.mxu1 }
 0x231   : > { %v726_v51 = vpop.f32.mrf.mxu0  ;;  %v797_v52 = vpop.f32.mrf.mxu1 }
 0x232   : > { %v804_v53 = vcombine.low %v724_v48, %v726_v51  ;;  %v805_v54 = vcombine.high %v724_v48, %v726_v51  ;;  %v806_v55 = vcombine.low %v795_v49, %v797_v52  ;;  %v807_v56 = vcombine.high %v795_v49, %v797_v52 }
 0x234   : > { %v814_v57 = vrot.slane %v804_v53, %v1966_v50  ;;  %v821_v58 = vrot.slane %v805_v54, %v1966_v50  ;;  %v828_v59 = vrot.slane %v806_v55, %v1966_v50  ;;  %v835_v60 = vrot.slane %v807_v56, %v1966_v50 }
 0x236   : > { %v836_v61 = vcombine.low %v814_v57, %v828_v59  ;;  %v837_v62 = vcombine.high %v814_v57, %v828_v59  ;;  %v838_v63 = vcombine.low %v821_v58, %v835_v60  ;;  %v839_v2 = vcombine.high %v821_v58, %v835_v60 }
 0x238   : > { %v846_v7 = vrot.slane %v836_v61, %v1966_v50  ;;  %v853_v8 = vrot.slane %v838_v63, %v1966_v50  ;;  %v860_v9 = vrot.slane %v837_v62, %v1966_v50  ;;  %v867_v10 = vrot.slane %v839_v2, %v1966_v50 }
 0x23a   : > { %v868_v14 = vcombine.high %v846_v7, %v846_v7  ;;  %v869_v15 = vcombine.high %v853_v8, %v853_v8  ;;  %v870_v16 = vcombine.high %v860_v9, %v860_v9  ;;  %v871_v17 = vcombine.high %v867_v10, %v867_v10 }
 0x23b   : > { %v1976_v19 = vadd.f32 %v846_v7, %v570_v3  ;;  %v1978_v20 = vadd.f32 %v1463_v4, %v860_v9  ;;  %v1980_v22 = vadd.f32 %v1469_v6, %v853_v8  ;;  %v1986_v25 = vadd.f32 %v1471_v12, %v867_v10 }
 0x23c   : > { %v1982_v23 = vadd.f32 %v1465_v5, %v868_v14  ;;  %v1984_v24 = vadd.f32 %v1467_v11, %v870_v16  ;;  %v1988_v26 = vadd.f32 %v1473_v13, %v869_v15  ;;  %v1992_v32 = vadd.f32 %v1475_v18, %v871_v17 }
 0x23d   : > { %v1476_v30 = vmul.f32 -1.442695, %v1976_v19  ;;  %v1477_v31 = vmul.f32 -1.442695, %v1978_v20  ;;  %v1480_v35 = vmul.f32 -1.442695, %v1980_v22 }
 0x23e   : > { %v1478_v33 = vmul.f32 -1.442695, %v1982_v23  ;;  %v1479_v34 = vmul.f32 -1.442695, %v1984_v24  ;;  %v944_v36 = vrot.slane %v1976_v19, 1  ;;  %v945_v38 = vrot.slane %v1978_v20, 1 }
 0x23f   : > { %1528 = vpow2.f32 %v1476_v30  ;;  %v1481_v37 = vmul.f32 -1.442695, %v1986_v25  ;;  %v1482_v39 = vmul.f32 -1.442695, %v1988_v26  ;;  %v946_v40 = vrot.slane %v1982_v23, 1 }
 0x240   : > { %1530 = vpow2.f32 %v1477_v31  ;;  %v1483_v41 = vmul.f32 -1.442695, %v1992_v32  ;;  %v947_v27 = vrot.slane %v1984_v24, 1  ;;  %v948_v42 = vrot.slane %v1980_v22, 1  ;;  %v2008_v31 = vld [vmem:[#allocation3] sm:$0xff] }
 0x241   : > { %1532 = vpow2.f32 %v1478_v33  ;;  %v1484_v0 = vmul.f32 -1.442695, %v944_v36  ;;  %v949_v44 = vrot.slane %v1986_v25, 1  ;;  %v1485_v45 = vmul.f32 -1.442695, %v945_v38 }
 0x242   : > { %1534 = vpow2.f32 %v1479_v34  ;;  %v950_v28 = vrot.slane %v1988_v26, 1  ;;  %v1486_v29 = vmul.f32 -1.442695, %v946_v40  ;;  %v951_v46 = vrot.slane %v1992_v32, 1 }
 0x243   : > { %1536 = vpow2.f32 %v1480_v35  ;;  %v1487_v47 = vmul.f32 -1.442695, %v947_v27  ;;  %v1488_v48 = vmul.f32 -1.442695, %v948_v42  ;;  %v1489_v49 = vmul.f32 -1.442695, %v949_v44 }
 0x244   : > { %1538 = vpow2.f32 %v1481_v37  ;;  %v1490_v51 = vmul.f32 -1.442695, %v950_v28  ;;  %v1491_v52 = vmul.f32 -1.442695, %v951_v46  ;;  %v1008_v35 = vrot.slane %v1976_v19, 2 }
 0x245   : > { %1540 = vpow2.f32 %v1482_v39  ;;  %v1009_v38 = vrot.slane %v1978_v20, 2  ;;  %v1010_v40 = vrot.slane %v1982_v23, 2  ;;  %v1011_v42 = vrot.slane %v1984_v24, 2 }
 0x246   : > { %1542 = vpow2.f32 %v1483_v41  ;;  %v1097_v41 = vcombine.high %v2008_v31, %v2008_v31  ;;  %v1032_v28 = vrot.slane %v1976_v19, 3  ;;  %v1013_v46 = vrot.slane %v1986_v25, 2 }
 0x247   : > { %1544 = vpow2.f32 %v1484_v0  ;;  %v1104_v0 = vrot.slane %v2008_v31, %v1966_v50  ;;  %v1015_v19 = vrot.slane %v1992_v32, 2 }
 0x248   : > { %1546 = vpow2.f32 %v1485_v45  ;;  %v1012_v45 = vrot.slane %v1980_v22, 2 }
 0x249   : > { %1548 = vpow2.f32 %v1486_v29 }
 0x24a   : > { %1550 = vpow2.f32 %v1487_v47  ;;  %v1033_v47 = vrot.slane %v1978_v20, 3  ;;  %v1036_v20 = vrot.slane %v1980_v22, 3 }
 0x24b   : > { %1552 = vpow2.f32 %v1488_v48 }
 0x24c   : > { %v1529_v53 = vpop.eup %1528  ;;  %1554 = vpow2.f32 %v1489_v49  ;;  %v1014_v49 = vrot.slane %v1988_v26, 2 }
 0x24d   : > { %v1531_v54 = vpop.eup %1530  ;;  %v912_v55 = vadd.f32 1.0, %v1529_v53  ;;  %1556 = vpow2.f32 %v1490_v51  ;;  %v1034_v51 = vrot.slane %v1982_v23, 3  ;;  %v1037_v23 = vrot.slane %v1986_v25, 3 }
 0x24e   : > { %v1533_v56 = vpop.eup %1532  ;;  %v913_v57 = vadd.f32 1.0, %v1531_v54  ;;  %1558 = vpow2.f32 %v1491_v52  ;;  %v1111_v52 = vrot.slane %v1097_v41, %v1966_v50  ;;  %v1035_v54 = vrot.slane %v1984_v24, 3 }
 0x24f   : > { %v1535_v58 = vpop.eup %1534  ;;  %v914_v59 = vadd.f32 1.0, %v1533_v56  ;;  %1560 = vrcp.f32 %v912_v55  ;;  %v1112_v55 = vcombine.high %v1104_v0, %v1104_v0 }
 0x250   : > { %v1537_v60 = vpop.eup %1536  ;;  %v915_v61 = vadd.f32 1.0, %v1535_v58  ;;  %1562 = vrcp.f32 %v913_v57  ;;  %v1492_v57 = vmul.f32 -1.442695, %v1032_v28  ;;  %v1113_v24 = vcombine.high %v1111_v52, %v1111_v52 }
 0x251   : > { %v1539_v62 = vpop.eup %1538  ;;  %v916_v63 = vadd.f32 1.0, %v1537_v60  ;;  %1564 = vrcp.f32 %v914_v59  ;;  %v1493_v59 = vmul.f32 -1.442695, %v1033_v47  ;;  %v1120_v60 = vrot.slane %v1104_v0, %v1966_v50 }
 0x252   : > { %v1541_v2 = vpop.eup %1540  ;;  %v917_v3 = vadd.f32 1.0, %v1539_v62  ;;  %1566 = vrcp.f32 %v915_v61  ;;  %v1038_v62 = vrot.slane %v1988_v26, 3  ;;  %v1134_v22 = vrot.slane %v1112_v55, %v1966_v50 }
 0x253   : > { %v1543_v4 = vpop.eup %1542  ;;  %v918_v5 = vadd.f32 1.0, %v1541_v2  ;;  %1568 = vrcp.f32 %v916_v63  ;;  %v1494_v63 = vmul.f32 -1.442695, %v1034_v51  ;;  %v1127_v26 = vrot.slane %v1111_v52, %v1966_v50 }
 0x254   : > { %v1545_v6 = vpop.eup %1544  ;;  %v919_v7 = vadd.f32 1.0, %v1543_v4  ;;  %1570 = vrcp.f32 %v917_v3  ;;  %v1039_v3 = vrot.slane %v1992_v32, 3  ;;  %v1495_v4 = vmul.f32 -1.442695, %v1035_v54 }
 0x255   : > { %v1547_v8 = vpop.eup %1546  ;;  %1572 = vrcp.f32 %v918_v5  ;;  %v984_v9 = vadd.f32 1.0, %v1545_v6  ;;  %v1496_v6 = vmul.f32 -1.442695, %v1036_v20  ;;  %v1141_v32 = vrot.slane %v1113_v24, %v1966_v50 }
 0x256   : > { %v1549_v10 = vpop.eup %1548  ;;  %1574 = vrcp.f32 %v919_v7  ;;  %v985_v11 = vadd.f32 1.0, %v1547_v8  ;;  %v1497_v7 = vmul.f32 -1.442695, %v1037_v23 }
 0x257   : > { %v1551_v12 = vpop.eup %1550  ;;  %v986_v13 = vadd.f32 1.0, %v1549_v10  ;;  %1576 = vrcp.f32 %v984_v9  ;;  %v1498_v9 = vmul.f32 -1.442695, %v1038_v62  ;;  %v1142_v10 = vcombine.high %v1120_v60, %v1120_v60 }
 0x258   : > { %v1553_v14 = vpop.eup %1552  ;;  %v987_v15 = vadd.f32 1.0, %v1551_v12  ;;  %1578 = vrcp.f32 %v985_v11  ;;  %v1499_v12 = vmul.f32 -1.442695, %v1039_v3 }
 0x259   : > { %v1555_v16 = vpop.eup %1554  ;;  %v988_v17 = vadd.f32 1.0, %v1553_v14  ;;  %1580 = vrcp.f32 %v986_v13  ;;  %v1144_v13 = vcombine.high %v1134_v22, %v1134_v22 }
 0x25a   : > { %v1557_v18 = vpop.eup %1556  ;;  %v989_v30 = vadd.f32 1.0, %v1555_v16  ;;  %1582 = vrcp.f32 %v987_v15 }
 0x25b   : > { %v1559_v33 = vpop.eup %1558  ;;  %v990_v34 = vadd.f32 1.0, %v1557_v18  ;;  %1584 = vrcp.f32 %v988_v17 }
 0x25c   : > { %v2011_v36 = vpop.eup %1560  ;;  %v991_v37 = vadd.f32 1.0, %v1559_v33  ;;  %1586 = vrcp.f32 %v989_v30  ;;  %v1143_v30 = vcombine.high %v1127_v26, %v1127_v26 }
 0x25d   : > { %v2014_v39 = vpop.eup %1562  ;;  %1588 = vrcp.f32 %v990_v34 }
 0x25e   : > { %v2019_v27 = vpop.eup %1564  ;;  %1590 = vrcp.f32 %v991_v37  ;;  %v1145_v37 = vcombine.high %v1141_v32, %v1141_v32 }
 0x25f   : > { %v2024_v44 = vpop.eup %1566  ;;  %1592 = vtanh.f32 %v1008_v35 }
 0x260   : > { %v2028_v29 = vpop.eup %1568  ;;  %1594 = vtanh.f32 %v1009_v38 }
 0x261   : > { %v2032_v48 = vpop.eup %1570  ;;  %1596 = vtanh.f32 %v1010_v40 }
 0x262   : > { %v2037_v53 = vpop.eup %1572  ;;  %1598 = vtanh.f32 %v1011_v42 }
 0x263   : > { %v2041_v56 = vpop.eup %1574  ;;  %1600 = vtanh.f32 %v1012_v45 }
 0x264   : > { %v1577_v58 = vpop.eup %1576  ;;  %1602 = vtanh.f32 %v1013_v46 }
 0x265   : > { %v1579_v61 = vpop.eup %1578  ;;  %1604 = vtanh.f32 %v1014_v49  ;;  %v1154_v15 = vmul.f32 %v1577_v58, %v1120_v60 }
 0x266   : > { %v1581_v2 = vpop.eup %1580  ;;  %1606 = vtanh.f32 %v1015_v19  ;;  %v1155_v17 = vmul.f32 %v1579_v61, %v1134_v22 }
 0x267   : > { %v1583_v5 = vpop.eup %1582  ;;  %1608 = vpow2.f32 %v1492_v57  ;;  %v1156_v33 = vmul.f32 %v1581_v2, %v1142_v10 }
 0x268   : > { %v1585_v25 = vpop.eup %1584  ;;  %1610 = vpow2.f32 %v1493_v59  ;;  %v1157_v38 = vmul.f32 %v1583_v5, %v1144_v13 }
 0x269   : > { %v1587_v8 = vpop.eup %1586  ;;  %1612 = vpow2.f32 %v1494_v63  ;;  %v1158_v42 = vmul.f32 %v1585_v25, %v1127_v26 }
 0x26a   : > { %v1589_v11 = vpop.eup %1588  ;;  %1614 = vpow2.f32 %v1495_v4  ;;  %v1159_v46 = vmul.f32 %v1587_v8, %v1141_v32 }
 0x26b   : > { %v1591_v14 = vpop.eup %1590  ;;  %1616 = vpow2.f32 %v1496_v6  ;;  %v1160_v52 = vmul.f32 %v1589_v11, %v1143_v30 }
 0x26c   : > { %v1593_v16 = vpop.eup %1592  ;;  %1618 = vpow2.f32 %v1497_v7  ;;  %v1161_v55 = vmul.f32 %v1591_v14, %v1145_v37 }
 0x26d   : > { %v1595_v18 = vpop.eup %1594  ;;  %1620 = vpow2.f32 %v1498_v9  ;;  %v1162_v34 = vmul.f32 %v1593_v16, %v2011_v36 }
 0x26e   : > { %v1597_v35 = vpop.eup %1596  ;;  %1622 = vpow2.f32 %v1499_v12  ;;  %v1163_v40 = vmul.f32 %v1595_v18, %v2014_v39 }
 0x26f   : > { %v1599_v41 = vpop.eup %1598  ;;  %v1164_v0 = vmul.f32 %v1597_v35, %v2019_v27  ;;  %v1170_v45 = vadd.f32 %v1162_v34, %v1154_v15  ;;  %v1199_v15 = vpop.permute.xlu0 %1198 }
 0x270   : > { %v1601_v28 = vpop.eup %1600  ;;  %v1165_v47 = vmul.f32 %v1599_v41, %v2024_v44  ;;  %v1171_v49 = vadd.f32 %v1163_v40, %v1155_v17  ;;  %vm1200_vm1 = vcmp.eq.s32.totalorder %v1199_v15, 1 }
 0x271   : > { %v1603_v51 = vpop.eup %1602  ;;  %v1166_v36 = vmul.f32 %v1601_v28, %v2028_v29  ;;  %v1172_v19 = vadd.f32 %v1164_v0, %v1156_v33  ;;  %1624 = vtanh.f32 %v1170_v45 }
 0x272   : > { %v1605_v54 = vpop.eup %1604  ;;  %v1167_v39 = vmul.f32 %v1603_v51, %v2032_v48  ;;  %v1173_v20 = vadd.f32 %v1165_v47, %v1157_v38  ;;  %1626 = vtanh.f32 %v1171_v49  ;;  %v1269_v23 = vcombine.low %v1170_v45, %v1171_v49 }
 0x273   : > { %v1607_v57 = vpop.eup %1606  ;;  %v1168_v27 = vmul.f32 %v1605_v54, %v2037_v53  ;;  %v1174_v58 = vadd.f32 %v1166_v36, %v1158_v42  ;;  %1628 = vtanh.f32 %v1172_v19 }
 0x274   : > { %v1609_v44 = vpop.eup %1608  ;;  %v1169_v59 = vmul.f32 %v1607_v57, %v2041_v56  ;;  %v1175_v60 = vadd.f32 %v1167_v39, %v1159_v46  ;;  %1630 = vtanh.f32 %v1173_v20  ;;  %v1270_v29 = vcombine.low %v1172_v19, %v1173_v20 }
 0x275   : > { %v1611_v61 = vpop.eup %1610  ;;  %v1072_v62 = vadd.f32 1.0, %v1609_v44  ;;  %v1176_v63 = vadd.f32 %v1168_v27, %v1160_v52  ;;  %1632 = vtanh.f32 %v1174_v58  ;;  %v1279_v22 = vrot.slane %v1269_v23, %v1966_v50 }
 0x276   : > { %v1613_v24 = vpop.eup %1612  ;;  %v1073_v48 = vadd.f32 1.0, %v1611_v61  ;;  %v1177_v2 = vadd.f32 %v1169_v59, %v1161_v55  ;;  %1634 = vtanh.f32 %v1175_v60  ;;  %v1271_v3 = vcombine.low %v1174_v58, %v1175_v60 }
 0x277   : > { %v1615_v4 = vpop.eup %1614  ;;  %v1074_v53 = vadd.f32 1.0, %v1613_v24  ;;  %1636 = vrcp.f32 %v1072_v62  ;;  %v1286_v5 = vrot.slane %v1270_v29, %v1966_v50 }
 0x278   : > { %v1617_v56 = vpop.eup %1616  ;;  %v1075_v6 = vadd.f32 1.0, %v1615_v4  ;;  %1638 = vrcp.f32 %v1073_v48  ;;  %v1272_v25 = vcombine.low %v1176_v63, %v1177_v2  ;;  %v1293_v11 = vrot.slane %v1271_v3, %v1966_v50 }
 0x279   : > { %v1619_v7 = vpop.eup %1618  ;;  %v1076_v8 = vadd.f32 1.0, %v1617_v56  ;;  %1640 = vrcp.f32 %v1074_v53  ;;  %v1301_v9 = vcombine.low %v1279_v22, %v1286_v5 }
 0x27a   : > { %v1621_v26 = vpop.eup %1620  ;;  %v1077_v10 = vadd.f32 1.0, %v1619_v7  ;;  %1642 = vrcp.f32 %v1075_v6  ;;  %v1300_v12 = vrot.slane %v1272_v25, %v1966_v50 }
 0x27b   : > { %v1623_v32 = vpop.eup %1622  ;;  %v1078_v13 = vadd.f32 1.0, %v1621_v26  ;;  %1644 = vrcp.f32 %v1076_v8  ;;  %v1309_v17 = vrot.slane %v1301_v9, %v1966_v50 }
 0x27c   : > { %v1079_v14 = vadd.f32 1.0, %v1623_v32  ;;  %1646 = vrcp.f32 %v1077_v10  ;;  %v1302_v16 = vcombine.low %v1293_v11, %v1300_v12 }
 0x27d   : > { %1648 = vrcp.f32 %v1078_v13 }
 0x27e   : > { %v1625_v18 = vpop.eup %1624  ;;  %1650 = vrcp.f32 %v1079_v14  ;;  %v1316_v30 = vrot.slane %v1302_v16, %v1966_v50 }
 0x27f   : > { %v1627_v33 = vpop.eup %1626  ;;  %1652 = vtanh.f32 %v1176_v63 }
 0x280   : > { %v1629_v34 = vpop.eup %1628  ;;  %1654 = vtanh.f32 %v1177_v2  ;;  %v1317_v35 = vcombine.low %v1309_v17, %v1316_v30 }
 0x281   : > { %v1631_v37 = vpop.eup %1630 }
 0x282   : > { %v1633_v38 = vpop.eup %1632  ;;  %v1319_v40 = vsel %vm1200_vm1, %v1317_v35, %v2008_v31 }
 0x283   : > { %v1635_v41 = vpop.eup %1634  ;;  %1320 = vst [vmem:[#allocation3] sm:$0xff] %v1319_v40 }
 0x284   : > { %v1637_v42 = vpop.eup %1636 }
 0x285   : > { %v1639_v0 = vpop.eup %1638  ;;  %v1186_v28 = vmul.f32 %v1637_v42, %v1625_v18 }
 0x286   : > { %v1641_v45 = vpop.eup %1640  ;;  %v1187_v46 = vmul.f32 %v1639_v0, %v1627_v33 }
 0x287   : > { %v1643_v47 = vpop.eup %1642  ;;  %v1188_v49 = vmul.f32 %v1641_v45, %v1629_v34 }
 0x288   : > { %v1645_v51 = vpop.eup %1644  ;;  %v1189_v52 = vmul.f32 %v1643_v47, %v1631_v37  ;;  %v1209_v39 = vcombine.low %v1186_v28, %v1187_v46 }
 0x289   : > { %v1647_v36 = vpop.eup %1646  ;;  %v1190_v54 = vmul.f32 %v1645_v51, %v1633_v38 }
 0x28a   : > { %v1649_v19 = vpop.eup %1648  ;;  %v1191_v55 = vmul.f32 %v1647_v36, %v1635_v41  ;;  %v1210_v20 = vcombine.low %v1188_v49, %v1189_v52  ;;  %v1219_v60 = vrot.slane %v1209_v39, %v1966_v50 }
 0x28b   : > { %v1651_v57 = vpop.eup %1650 }
 0x28c   : > { %v1653_v27 = vpop.eup %1652  ;;  %v1226_v31 = vrot.slane %v1210_v20, %v1966_v50  ;;  %v1211_v59 = vcombine.low %v1190_v54, %v1191_v55 }
 0x28d   : > { %v1655_v58 = vpop.eup %1654  ;;  %v1192_v23 = vmul.f32 %v1653_v27, %v1649_v19 }
 0x28e   : > { %v1193_v44 = vmul.f32 %v1655_v58, %v1651_v57  ;;  %v1241_v61 = vcombine.low %v1219_v60, %v1226_v31  ;;  %v1233_v62 = vrot.slane %v1211_v59, %v1966_v50 }
 0x290   : > { %v1212_v29 = vcombine.low %v1192_v23, %v1193_v44  ;;  %v1249_v48 = vrot.slane %v1241_v61, %v1966_v50 }
 0x292   : > { %v1240_v63 = vrot.slane %v1212_v29, %v1966_v50 }
 0x294   : > { %v1242_v24 = vcombine.low %v1233_v62, %v1240_v63 }
 0x296   : > { %v1256_v2 = vrot.slane %v1242_v24, %v1966_v50 }
 0x298   : > { %v1257_v3 = vcombine.low %v1249_v48, %v1256_v2 }
 0x29a   : > { %v1259_v4 = vsel %vm1200_vm1, %v1257_v3, %v1959_v43  ;;  %v1321_v53 = vsel %vm1200_vm1, %v1257_v3, 0.0 }
 0x29b   : > { %1260 = vst [vmem:[#allocation2] sm:$0xff] %v1259_v4  ;;  %v1323_v22 = vcombine.high %v1321_v53, %v1321_v53  ;;  %v1330_v5 = vrot.slane %v1321_v53, %v1966_v50 }
 0x29d   : > { %v1337_v56 = vrot.slane %v1323_v22, %v1966_v50  ;;  %v1338_v6 = vcombine.high %v1330_v5, %v1330_v5  ;;  %v1346_v25 = vrot.slane %v1330_v5, %v1966_v50  ;;  %1500 = vst.sshfl [vmem:[%s1380_s21] sm:$0x1 pattern:$0x73625140] %v1330_v5 }
 0x29f   : > { %v1339_v7 = vcombine.high %v1337_v56, %v1337_v56  ;;  %v1353_v8 = vrot.slane %v1337_v56, %v1966_v50  ;;  %v1360_v9 = vrot.slane %v1338_v6, %v1966_v50  ;;  %v1368_v26 = vcombine.high %v1346_v25, %v1346_v25  ;;  %1501 = vst.sshfl [vmem:[%s1380_s21 + $0x10] sm:$0x1 pattern:$0x73625140] %v1338_v6 }
 0x2a0   : > { %1502 = vst.sshfl [vmem:[%s1380_s21 + $0x40] sm:$0x1 pattern:$0x73625140] %v1337_v56 }
 0x2a1   : > { %v1367_v43 = vrot.slane %v1339_v7, %v1966_v50  ;;  %v1369_v10 = vcombine.high %v1353_v8, %v1353_v8  ;;  %v1370_v11 = vcombine.high %v1360_v9, %v1360_v9  ;;  %1383 = vst [vmem:[%s1380_s21 + $0x20] sm:$0x1] %v1368_v26  ;;  %1503 = vst.sshfl [vmem:[%s1380_s21 + $0x50] sm:$0x1 pattern:$0x73625140] %v1339_v7 }
 0x2a2   :  { %560 = sbr.rel (!%p558_p1) target bundleno = 333 (0x14d), region = 76  ;;  %v1389_v32 = vld [vmem:[#allocation2] sm:$0xff] (%p558_p1) }
 0x2a3   : > { %v1371_v12 = vcombine.high %v1367_v43, %v1367_v43  ;;  %1384 = vst [vmem:[%s1380_s21 + $0x30] sm:$0x1] %v1370_v11  ;;  %1387 = vst [vmem:[%s1380_s21 + $0x60] sm:$0x1] %v1369_v10 }
 0x2a4   :  { %1390 = vst [vmem:[#allocation12] sm:$0xff] (%p558_p1), %v1389_v32 }
 0x2a5   : > { %1388 = vst [vmem:[%s1380_s21 + $0x70] sm:$0x1] %v1371_v12 }
 0x2a7   :  { %1727 = shalt.err (!%p1724_p6)
}
 0x2a8   :  { %1402 = dma.vmem_to_hbm [thread:$0]  %s1397_s23, 2048, %s2100_s5, [#allocation7], %s1776_s7, %s1776_s7, %s1777_s8  }
 0x2a9   :  { %s1736_s29 = scalar_lea.vmem %s1410_s25, 128  ;;  %p1741_p8 = scmp.lt.s32.totalorder %s1410_s25, %s1410_s25 }
 0x2aa   :  { %p1737_p7 = scmp.ne.s32.totalorder %s1410_s25, %s1736_s29  ;;  %p1742_p9 = scmp.lt.s32.totalorder %s1736_s29, %s1736_s29 }
 0x2ac   :  { %p1743_p10 = por %p1742_p9, %p1741_p8 }
 0x2ae   :  { %p1744_p11 = pnand %p1743_p10, %p1737_p7 }
 0x2b0   :  { %1747 = shalt.err (!%p1744_p11)
}
 0x2b1   :  { %1412 = dma.vmem_to_hbm [thread:$0]  %s1410_s25, 128, %s2101_s6, [#allocation13]  }
 0x2b2   :  { %1764 = dma.done.wait [#allocation7], 2048  }
 0x2b3   :  { %1765 = vsyncadd [#allocation7], 4294965248 }
 0x2b4   :  { %1766 = dma.done.wait [#allocation13], 128  }
 0x2b5   :  { %1767 = vsyncadd [#allocation13], 4294967168 }
 0x2b6   :  { %1419 = vsyncpa [#allocation6], 1 }
 0x2b7   :  { %1420 = vsyncpa [#allocation9], 1 }
 0x2b8   :  { %1421 = vsyncpa [#allocation7], 1 }
 0x2b9   :  { %1422 = vsyncpa [#allocation13], 1 }

</bundles_post_ra>
